<compile_context>
chip_gen: v7x
topology: tpu7x:2x2x1
jax: 0.10.0
libtpu: 0.0.40
codegen_flags: <defaults>
</compile_context>

<pallas_src>
import functools

import jax
import jax.numpy as jnp
from jax import lax
from jax.experimental import pallas as pl
from jax.experimental.pallas import tpu as pltpu

_EPS = 1e-5
_STAT_LANES = 8                       # per-tile BN partials: (n_tiles, C, 8), not 128-lane bcast
_VMEM_LIMIT = 32 * 1024 * 1024        # explicit scoped-VMEM budget; far above the <3 MiB tile
                                      # working set, below every generation's physical VMEM
                                      # (including v7x's 64 MiB)


# ----------------------------------------------------------------------------- kernels
def _conv_stats_kernel(w_ref, p_ref, y_ref, s_ref, ss_ref, *, precision):
    """One MXU matmul per pixel tile + per-tile BN partial statistics.

    w_ref : (C, K)        matmul dtype  (K = 9*C_in; conv taps folded via im2col)
    p_ref : (K, TN)       matmul dtype  (im2col patches, pixels lane-dense)
    y_ref : (C, TN)       out dtype     conv output tile (bf16 by default)
    s_ref : (1, C, 8) f32               per-tile per-channel sum (from the f32 accumulator)
    ss_ref: (1, C, 8) f32               per-tile per-channel sum of squares
    """
    y = jnp.dot(w_ref[...], p_ref[...],
                preferred_element_type=jnp.float32, precision=precision)
    y_ref[...] = y.astype(y_ref.dtype)
    stat_shape = (y.shape[0], s_ref.shape[-1])
    s_ref[0] = jnp.broadcast_to(jnp.sum(y, axis=1, keepdims=True), stat_shape)
    ss_ref[0] = jnp.broadcast_to(jnp.sum(y * y, axis=1, keepdims=True), stat_shape)


def _bn_relu_kernel(y_ref, scale_ref, shift_ref, o_ref):
    """Folded training-mode BatchNorm (single per-channel FMA) + ReLU on a (C, TN) tile."""
    y = y_ref[...].astype(jnp.float32)
    o_ref[...] = jnp.maximum(y * scale_ref[...] + shift_ref[...], 0.0).astype(o_ref.dtype)


# ----------------------------------------------------------------------- pallas wrappers
def _conv_stats_call(w_mat, patches, *, block_cols, out_dtype, precision):
    c_out, k = w_mat.shape
    _, p_pad = patches.shape
    n_tiles = p_pad // block_cols

    kernel = functools.partial(_conv_stats_kernel, precision=precision)
    return pl.pallas_call(
        kernel,
        out_shape=(
            jax.ShapeDtypeStruct((c_out, p_pad), out_dtype),
            jax.ShapeDtypeStruct((n_tiles, c_out, _STAT_LANES), jnp.float32),
            jax.ShapeDtypeStruct((n_tiles, c_out, _STAT_LANES), jnp.float32),
        ),
        grid=(n_tiles,),
        in_specs=[
            pl.BlockSpec((c_out, k), lambda t: (0, 0)),           # weights stay resident
            pl.BlockSpec((k, block_cols), lambda t: (0, t)),      # pixel tiles (lane-dense)
        ],
        out_specs=(
            pl.BlockSpec((c_out, block_cols), lambda t: (0, t)),  # lane-dense output tile
            pl.BlockSpec((1, c_out, _STAT_LANES), lambda t: (t, 0, 0)),
            pl.BlockSpec((1, c_out, _STAT_LANES), lambda t: (t, 0, 0)),
        ),
        compiler_params=pltpu.CompilerParams(
            dimension_semantics=("parallel",),
            vmem_limit_bytes=_VMEM_LIMIT,
        ),
    )(w_mat, patches)


def _bn_relu_call(y, scale, shift, *, block_cols, out_dtype):
    c, p_pad = y.shape
    n_tiles = p_pad // block_cols
    return pl.pallas_call(
        _bn_relu_kernel,
        out_shape=jax.ShapeDtypeStruct((c, p_pad), out_dtype),
        grid=(n_tiles,),
        in_specs=[
            pl.BlockSpec((c, block_cols), lambda t: (0, t)),
            pl.BlockSpec((c, 1), lambda t: (0, 0)),
            pl.BlockSpec((c, 1), lambda t: (0, 0)),
        ],
        out_specs=pl.BlockSpec((c, block_cols), lambda t: (0, t)),
        compiler_params=pltpu.CompilerParams(
            dimension_semantics=("parallel",),
            vmem_limit_bytes=_VMEM_LIMIT,
        ),
    )(y, scale.reshape(c, 1).astype(jnp.float32), shift.reshape(c, 1).astype(jnp.float32))


# ------------------------------------------------------------------------- host helpers
def _auto_block_cols(n_pix):
    """Biggest 256-multiple <= 2048 that still leaves ~8 tiles (v7x has 2 TensorCores)."""
    target = (n_pix // (8 * 256)) * 256
    return max(256, min(2048, target))


def _im2col_3x3_cm(x_cm):
    """(C, N, H, W) -> (9*C, N*H*W); rows ordered (kh, kw)-major, channel-minor."""
    c, n, h, w = x_cm.shape
    xp = jnp.pad(x_cm, ((0, 0), (0, 0), (1, 1), (1, 1)))
    taps = [xp[:, :, kh:kh + h, kw:kw + w].reshape(c, n * h * w)
            for kh in range(3) for kw in range(3)]
    return jnp.concatenate(taps, axis=0)


def _bn_scale_shift(s_partial, ss_partial, count, gamma, beta):
    """Reduce per-tile partial stats and fold training-mode BN into scale/shift."""
    s = jnp.sum(s_partial[:, :, 0], axis=0)
    ss = jnp.sum(ss_partial[:, :, 0], axis=0)
    mean = s / count
    var = jnp.maximum(ss / count - mean * mean, 0.0)       # one-pass biased variance
    scale = gamma.astype(jnp.float32) * lax.rsqrt(var + _EPS)
    shift = beta.astype(jnp.float32) - mean * scale
    return scale, shift


def _convblock_cm(x_cm, params, *, block_cols, matmul_dtype, matmul_precision):
    """Channel-major core: (C_in, N, H, W) -> (64, N, H, W), everything lane-dense."""
    w1, _b1, g1, be1, w2, _b2, g2, be2 = params   # conv biases cancelled by BN mean subtraction
    c_in, n, h, w = x_cm.shape
    c1, c2 = w1.shape[0], w2.shape[0]
    n_pix = n * h * w
    if block_cols is None:
        block_cols = _auto_block_cols(n_pix)
    assert block_cols % 256 == 0
    p_pad = ((n_pix + block_cols - 1) // block_cols) * block_cols

    def pad_pixels(m):
        return m if p_pad == n_pix else jnp.pad(m, ((0, 0), (0, p_pad - n_pix)))

    # ---- layer 1: conv(3 -> 16) + partial stats, then folded BN + ReLU (bf16 hidden) ----
    patches1 = pad_pixels(_im2col_3x3_cm(x_cm.astype(matmul_dtype)))         # (27, p_pad) bf16
    w1_mat = jnp.transpose(w1, (0, 2, 3, 1)).reshape(c1, 9 * c_in).astype(matmul_dtype)
    y1, s1, ss1 = _conv_stats_call(w1_mat, patches1, block_cols=block_cols,
                                   out_dtype=matmul_dtype, precision=matmul_precision)
    scale1, shift1 = _bn_scale_shift(s1, ss1, n_pix, g1, be1)
    h1 = _bn_relu_call(y1, scale1, shift1, block_cols=block_cols,
                       out_dtype=matmul_dtype)                               # (16, p_pad) bf16

    # ---- layer 2: conv(16 -> 64) + partial stats, then folded BN + ReLU (f32 output) ----
    h1_cm = h1[:, :n_pix].reshape(c1, n, h, w)       # drop padded columns BEFORE im2col (BN stats)
    patches2 = pad_pixels(_im2col_3x3_cm(h1_cm))                             # (144, p_pad) bf16
    w2_mat = jnp.transpose(w2, (0, 2, 3, 1)).reshape(c2, 9 * c1).astype(matmul_dtype)
    y2, s2, ss2 = _conv_stats_call(w2_mat, patches2, block_cols=block_cols,
                                   out_dtype=matmul_dtype, precision=matmul_precision)
    scale2, shift2 = _bn_scale_shift(s2, ss2, n_pix, g2, be2)
    out = _bn_relu_call(y2, scale2, shift2, block_cols=block_cols,
                        out_dtype=jnp.float32)                               # (64, p_pad) f32

    return out[:, :n_pix].reshape(c2, n, h, w)


def resblock_forward(x_nchw, params, *, block_cols=None,
                     matmul_dtype=jnp.bfloat16, matmul_precision=None):
    """Returns convblock(x) as (N, 64, H, W) float32.

    NCHW<->channel-major conversion lives only here; stacked blocks should call
    _convblock_cm directly and convert once at the model boundary.
    """
    x_cm = jnp.transpose(x_nchw, (1, 0, 2, 3))                               # (Cin, N, H, W)
    out_cm = _convblock_cm(x_cm, params, block_cols=block_cols,
                           matmul_dtype=matmul_dtype, matmul_precision=matmul_precision)
    # TODO(synk): residual add x + convblock(x) omitted (ill-typed: 3 vs 64 channels).
    return jnp.transpose(out_cm, (1, 0, 2, 3)).astype(jnp.float32)


# --------------------------------------------------------------------------- reference
def resblock_reference(x_nchw, params):
    """Pure-JAX f32 reference (training-mode BN, with conv biases, two-pass variance)."""
    w1, b1, g1, be1, w2, b2, g2, be2 = params

    def conv(x, wt, b):
        y = lax.conv_general_dilated(
            x, wt, window_strides=(1, 1), padding=((1, 1), (1, 1)),
            dimension_numbers=("NCHW", "OIHW", "NCHW"),
            precision=lax.Precision.HIGHEST)
        return y + b[None, :, None, None]

    def bn_relu(x, g, be):
        m = jnp.mean(x, axis=(0, 2, 3), keepdims=True)
        v = jnp.mean((x - m) ** 2, axis=(0, 2, 3), keepdims=True)
        y = (x - m) * lax.rsqrt(v + _EPS) * g[None, :, None, None] + be[None, :, None, None]
        return jnp.maximum(y, 0.0)

    hidden = bn_relu(conv(x_nchw, w1, b1), g1, be1)
    return bn_relu(conv(hidden, w2, b2), g2, be2)


if __name__ == "__main__":
    key = jax.random.PRNGKey(0)
    k_x, k_w1, k_b1, k_w2, k_b2 = jax.random.split(key, 5)

    N, C_IN, H, W = 2, 3, 16, 16
    x = jax.random.normal(k_x, (N, C_IN, H, W), jnp.float32)

    bound1 = 1.0 / (3 * 3 * 3) ** 0.5
    w1 = jax.random.uniform(k_w1, (16, 3, 3, 3), jnp.float32, -bound1, bound1)
    b1 = jax.random.uniform(k_b1, (16,), jnp.float32, -bound1, bound1)
    bound2 = 1.0 / (16 * 3 * 3) ** 0.5
    w2 = jax.random.uniform(k_w2, (64, 16, 3, 3), jnp.float32, -bound2, bound2)
    b2 = jax.random.uniform(k_b2, (64,), jnp.float32, -bound2, bound2)
    g1, be1 = jnp.ones((16,), jnp.float32), jnp.zeros((16,), jnp.float32)
    g2, be2 = jnp.ones((64,), jnp.float32), jnp.zeros((64,), jnp.float32)
    params = (w1, b1, g1, be1, w2, b2, g2, be2)

    ref = jax.block_until_ready(resblock_reference(x, params))

    # Algorithm check at full f32 MXU precision (tight tolerance).
    fwd_f32 = jax.jit(functools.partial(
        resblock_forward, matmul_dtype=jnp.float32,
        matmul_precision=lax.Precision.HIGHEST))
    out_f32 = jax.block_until_ready(fwd_f32(x, params))
    assert out_f32.shape == (N, 64, H, W) and out_f32.dtype == jnp.float32
    err_f32 = float(jnp.abs(out_f32 - ref).max())
    assert err_f32 < 2e-3, err_f32

    # Performance default: bf16 patches / weights / intermediates, f32 accumulation + f32
    # BN statistics.  Looser tolerance is purely bf16 input/intermediate quantization.
    fwd_bf16 = jax.jit(resblock_forward)
    out_bf16 = jax.block_until_ready(fwd_bf16(x, params))
    assert out_bf16.shape == (N, 64, H, W) and out_bf16.dtype == jnp.float32
    assert jnp.allclose(out_bf16, ref, atol=5e-2, rtol=5e-2), \
        float(jnp.abs(out_bf16 - ref).max())

    print("KERNEL_OK")
</pallas_src>

<mosaic_0001>
module attributes {stable_mosaic.version = 11 : i64} {
  func.func @_conv_stats_kernel(%arg0: i32, %arg1: memref<16x27xf32, #tpu.memory_space<vmem>>, %arg2: memref<27x256xf32, #tpu.memory_space<vmem>>, %arg3: memref<16x256xf32, #tpu.memory_space<vmem>>, %arg4: memref<1x16x8xf32, #tpu.memory_space<vmem>>, %arg5: memref<1x16x8xf32, #tpu.memory_space<vmem>>) attributes {dimension_semantics = [#tpu.dimension_semantics<parallel>], iteration_bounds = array<i64: 2>, scalar_prefetch = 0 : i64, scratch_operands = 0 : i64, tpu.core_type = #tpu.core_type<tc>, window_params = [{pipeline_mode = #tpu.pipeline_mode<synchronous>, transform_indices = @transform_0, window_bounds = array<i64: 16, 27>}, {transform_indices = @transform_1, window_bounds = array<i64: 27, 256>}, {transform_indices = @transform_2, window_bounds = array<i64: 16, 256>}, {transform_indices = @transform_3, window_bounds = array<i64: 1, 16, 8>}, {transform_indices = @transform_4, window_bounds = array<i64: 1, 16, 8>}]} {
    %c0 = arith.constant 0 : index
    %c0_0 = arith.constant 0 : index
    %0 = vector.load %arg1[%c0, %c0_0] : memref<16x27xf32, #tpu.memory_space<vmem>>, vector<16x27xf32>
    %c0_1 = arith.constant 0 : index
    %c0_2 = arith.constant 0 : index
    %1 = vector.load %arg2[%c0_1, %c0_2] : memref<27x256xf32, #tpu.memory_space<vmem>>, vector<27x256xf32>
    %cst = arith.constant dense<0.000000e+00> : vector<16x256xf32>
    %2 = tpu.matmul %0, %1, %cst {dimension_numbers = #tpu.dot_dimension_numbers<[1], [0], [0], [1], [0, 0, 1, 1], [], []>, precision = #tpu.contract_precision<fp32>} : vector<16x27xf32>, vector<27x256xf32>, vector<16x256xf32> -> vector<16x256xf32>
    %c0_3 = arith.constant 0 : index
    %c0_4 = arith.constant 0 : index
    %3 = vector.load %arg3[%c0_3, %c0_4] : memref<16x256xf32, #tpu.memory_space<vmem>>, vector<16x256xf32>
    tpu.vector_store %arg3[%c0_3, %c0_4], %2 {strides = array<i32>} : memref<16x256xf32, #tpu.memory_space<vmem>>, vector<16x256xf32>,
    %cst_5 = arith.constant dense<0.000000e+00> : vector<16xf32>
    %4 = vector.multi_reduction <add>, %2, %cst_5 [1] : vector<16x256xf32> to vector<16xf32>
    %5 = vector.shape_cast %4 : vector<16xf32> to vector<16x1xf32>
    %6 = vector.shape_cast %5 : vector<16x1xf32> to vector<16x1xf32>
    %7 = vector.broadcast %6 : vector<16x1xf32> to vector<16x8xf32>
    %c0_6 = arith.constant 0 : index
    %c0_7 = arith.constant 0 : index
    %c0_8 = arith.constant 0 : index
    %8 = vector.load %arg4[%c0_6, %c0_7, %c0_8] : memref<1x16x8xf32, #tpu.memory_space<vmem>>, vector<1x16x8xf32>
    %9 = vector.shape_cast %8 : vector<1x16x8xf32> to vector<16x8xf32>
    %10 = vector.shape_cast %7 : vector<16x8xf32> to vector<1x16x8xf32>
    tpu.vector_store %arg4[%c0_6, %c0_7, %c0_8], %10 {strides = array<i32>} : memref<1x16x8xf32, #tpu.memory_space<vmem>>, vector<1x16x8xf32>,
    %11 = arith.mulf %2, %2 : vector<16x256xf32>
    %cst_9 = arith.constant dense<0.000000e+00> : vector<16xf32>
    %12 = vector.multi_reduction <add>, %11, %cst_9 [1] : vector<16x256xf32> to vector<16xf32>
    %13 = vector.shape_cast %12 : vector<16xf32> to vector<16x1xf32>
    %14 = vector.shape_cast %13 : vector<16x1xf32> to vector<16x1xf32>
    %15 = vector.broadcast %14 : vector<16x1xf32> to vector<16x8xf32>
    %c0_10 = arith.constant 0 : index
    %c0_11 = arith.constant 0 : index
    %c0_12 = arith.constant 0 : index
    %16 = vector.load %arg5[%c0_10, %c0_11, %c0_12] : memref<1x16x8xf32, #tpu.memory_space<vmem>>, vector<1x16x8xf32>
    %17 = vector.shape_cast %16 : vector<1x16x8xf32> to vector<16x8xf32>
    %18 = vector.shape_cast %15 : vector<16x8xf32> to vector<1x16x8xf32>
    tpu.vector_store %arg5[%c0_10, %c0_11, %c0_12], %18 {strides = array<i32>} : memref<1x16x8xf32, #tpu.memory_space<vmem>>, vector<1x16x8xf32>,
    return
  }
  func.func @transform_0(%arg0: i32) -> (i32, i32) {
    %c0_i32 = arith.constant 0 : i32
    %c0_i32_0 = arith.constant 0 : i32
    %c0_i32_1 = arith.constant 0 : i32
    return %c0_i32, %c0_i32_0 : i32, i32
  }
  func.func @transform_1(%arg0: i32) -> (i32, i32) {
    %c0_i32 = arith.constant 0 : i32
    %c0_i32_0 = arith.constant 0 : i32
    return %c0_i32, %arg0 : i32, i32
  }
  func.func @transform_2(%arg0: i32) -> (i32, i32) {
    %c0_i32 = arith.constant 0 : i32
    %c0_i32_0 = arith.constant 0 : i32
    return %c0_i32, %arg0 : i32, i32
  }
  func.func @transform_3(%arg0: i32) -> (i32, i32, i32) {
    %c0_i32 = arith.constant 0 : i32
    %c0_i32_0 = arith.constant 0 : i32
    %c0_i32_1 = arith.constant 0 : i32
    return %arg0, %c0_i32, %c0_i32_0 : i32, i32, i32
  }
  func.func @transform_4(%arg0: i32) -> (i32, i32, i32) {
    %c0_i32 = arith.constant 0 : i32
    %c0_i32_0 = arith.constant 0 : i32
    %c0_i32_1 = arith.constant 0 : i32
    return %arg0, %c0_i32, %c0_i32_0 : i32, i32, i32
  }
}

module attributes {stable_mosaic.version = 11 : i64} {
  func.func @_bn_relu_kernel(%arg0: i32, %arg1: memref<16x256xf32, #tpu.memory_space<vmem>>, %arg2: memref<16x1xf32, #tpu.memory_space<vmem>>, %arg3: memref<16x1xf32, #tpu.memory_space<vmem>>, %arg4: memref<16x256xf32, #tpu.memory_space<vmem>>) attributes {dimension_semantics = [#tpu.dimension_semantics<parallel>], iteration_bounds = array<i64: 2>, scalar_prefetch = 0 : i64, scratch_operands = 0 : i64, tpu.core_type = #tpu.core_type<tc>, window_params = [{transform_indices = @transform_0, window_bounds = array<i64: 16, 256>}, {pipeline_mode = #tpu.pipeline_mode<synchronous>, transform_indices = @transform_1, window_bounds = array<i64: 16, 1>}, {pipeline_mode = #tpu.pipeline_mode<synchronous>, transform_indices = @transform_2, window_bounds = array<i64: 16, 1>}, {transform_indices = @transform_3, window_bounds = array<i64: 16, 256>}]} {
    %c0 = arith.constant 0 : index
    %c0_0 = arith.constant 0 : index
    %0 = vector.load %arg1[%c0, %c0_0] : memref<16x256xf32, #tpu.memory_space<vmem>>, vector<16x256xf32>
    %c0_1 = arith.constant 0 : index
    %c0_2 = arith.constant 0 : index
    %1 = vector.load %arg2[%c0_1, %c0_2] : memref<16x1xf32, #tpu.memory_space<vmem>>, vector<16x1xf32>
    %2 = vector.broadcast %1 : vector<16x1xf32> to vector<16x256xf32>
    %3 = arith.mulf %0, %2 : vector<16x256xf32>
    %c0_3 = arith.constant 0 : index
    %c0_4 = arith.constant 0 : index
    %4 = vector.load %arg3[%c0_3, %c0_4] : memref<16x1xf32, #tpu.memory_space<vmem>>, vector<16x1xf32>
    %5 = vector.broadcast %4 : vector<16x1xf32> to vector<16x256xf32>
    %6 = arith.addf %3, %5 : vector<16x256xf32>
    %cst = arith.constant 0.000000e+00 : f32
    %7 = vector.broadcast %cst : f32 to vector<16x256xf32>
    %8 = arith.maximumf %6, %7 : vector<16x256xf32>
    %c0_5 = arith.constant 0 : index
    %c0_6 = arith.constant 0 : index
    %9 = vector.load %arg4[%c0_5, %c0_6] : memref<16x256xf32, #tpu.memory_space<vmem>>, vector<16x256xf32>
    tpu.vector_store %arg4[%c0_5, %c0_6], %8 {strides = array<i32>} : memref<16x256xf32, #tpu.memory_space<vmem>>, vector<16x256xf32>,
    return
  }
  func.func @transform_0(%arg0: i32) -> (i32, i32) {
    %c0_i32 = arith.constant 0 : i32
    %c0_i32_0 = arith.constant 0 : i32
    return %c0_i32, %arg0 : i32, i32
  }
  func.func @transform_1(%arg0: i32) -> (i32, i32) {
    %c0_i32 = arith.constant 0 : i32
    %c0_i32_0 = arith.constant 0 : i32
    %c0_i32_1 = arith.constant 0 : i32
    return %c0_i32, %c0_i32_0 : i32, i32
  }
  func.func @transform_2(%arg0: i32) -> (i32, i32) {
    %c0_i32 = arith.constant 0 : i32
    %c0_i32_0 = arith.constant 0 : i32
    %c0_i32_1 = arith.constant 0 : i32
    return %c0_i32, %c0_i32_0 : i32, i32
  }
  func.func @transform_3(%arg0: i32) -> (i32, i32) {
    %c0_i32 = arith.constant 0 : i32
    %c0_i32_0 = arith.constant 0 : i32
    return %c0_i32, %arg0 : i32, i32
  }
}

module attributes {stable_mosaic.version = 11 : i64} {
  func.func @_conv_stats_kernel(%arg0: i32, %arg1: memref<64x144xf32, #tpu.memory_space<vmem>>, %arg2: memref<144x256xf32, #tpu.memory_space<vmem>>, %arg3: memref<64x256xf32, #tpu.memory_space<vmem>>, %arg4: memref<1x64x8xf32, #tpu.memory_space<vmem>>, %arg5: memref<1x64x8xf32, #tpu.memory_space<vmem>>) attributes {dimension_semantics = [#tpu.dimension_semantics<parallel>], iteration_bounds = array<i64: 2>, scalar_prefetch = 0 : i64, scratch_operands = 0 : i64, tpu.core_type = #tpu.core_type<tc>, window_params = [{pipeline_mode = #tpu.pipeline_mode<synchronous>, transform_indices = @transform_0, window_bounds = array<i64: 64, 144>}, {transform_indices = @transform_1, window_bounds = array<i64: 144, 256>}, {transform_indices = @transform_2, window_bounds = array<i64: 64, 256>}, {transform_indices = @transform_3, window_bounds = array<i64: 1, 64, 8>}, {transform_indices = @transform_4, window_bounds = array<i64: 1, 64, 8>}]} {
    %c0 = arith.constant 0 : index
    %c0_0 = arith.constant 0 : index
    %0 = vector.load %arg1[%c0, %c0_0] : memref<64x144xf32, #tpu.memory_space<vmem>>, vector<64x144xf32>
    %c0_1 = arith.constant 0 : index
    %c0_2 = arith.constant 0 : index
    %1 = vector.load %arg2[%c0_1, %c0_2] : memref<144x256xf32, #tpu.memory_space<vmem>>, vector<144x256xf32>
    %cst = arith.constant dense<0.000000e+00> : vector<64x256xf32>
    %2 = tpu.matmul %0, %1, %cst {dimension_numbers = #tpu.dot_dimension_numbers<[1], [0], [0], [1], [0, 0, 1, 1], [], []>, precision = #tpu.contract_precision<fp32>} : vector<64x144xf32>, vector<144x256xf32>, vector<64x256xf32> -> vector<64x256xf32>
    %c0_3 = arith.constant 0 : index
    %c0_4 = arith.constant 0 : index
    %3 = vector.load %arg3[%c0_3, %c0_4] : memref<64x256xf32, #tpu.memory_space<vmem>>, vector<64x256xf32>
    tpu.vector_store %arg3[%c0_3, %c0_4], %2 {strides = array<i32>} : memref<64x256xf32, #tpu.memory_space<vmem>>, vector<64x256xf32>,
    %cst_5 = arith.constant dense<0.000000e+00> : vector<64xf32>
    %4 = vector.multi_reduction <add>, %2, %cst_5 [1] : vector<64x256xf32> to vector<64xf32>
    %5 = vector.shape_cast %4 : vector<64xf32> to vector<64x1xf32>
    %6 = vector.shape_cast %5 : vector<64x1xf32> to vector<64x1xf32>
    %7 = vector.broadcast %6 : vector<64x1xf32> to vector<64x8xf32>
    %c0_6 = arith.constant 0 : index
    %c0_7 = arith.constant 0 : index
    %c0_8 = arith.constant 0 : index
    %8 = vector.load %arg4[%c0_6, %c0_7, %c0_8] : memref<1x64x8xf32, #tpu.memory_space<vmem>>, vector<1x64x8xf32>
    %9 = vector.shape_cast %8 : vector<1x64x8xf32> to vector<64x8xf32>
    %10 = vector.shape_cast %7 : vector<64x8xf32> to vector<1x64x8xf32>
    tpu.vector_store %arg4[%c0_6, %c0_7, %c0_8], %10 {strides = array<i32>} : memref<1x64x8xf32, #tpu.memory_space<vmem>>, vector<1x64x8xf32>,
    %11 = arith.mulf %2, %2 : vector<64x256xf32>
    %cst_9 = arith.constant dense<0.000000e+00> : vector<64xf32>
    %12 = vector.multi_reduction <add>, %11, %cst_9 [1] : vector<64x256xf32> to vector<64xf32>
    %13 = vector.shape_cast %12 : vector<64xf32> to vector<64x1xf32>
    %14 = vector.shape_cast %13 : vector<64x1xf32> to vector<64x1xf32>
    %15 = vector.broadcast %14 : vector<64x1xf32> to vector<64x8xf32>
    %c0_10 = arith.constant 0 : index
    %c0_11 = arith.constant 0 : index
    %c0_12 = arith.constant 0 : index
    %16 = vector.load %arg5[%c0_10, %c0_11, %c0_12] : memref<1x64x8xf32, #tpu.memory_space<vmem>>, vector<1x64x8xf32>
    %17 = vector.shape_cast %16 : vector<1x64x8xf32> to vector<64x8xf32>
    %18 = vector.shape_cast %15 : vector<64x8xf32> to vector<1x64x8xf32>
    tpu.vector_store %arg5[%c0_10, %c0_11, %c0_12], %18 {strides = array<i32>} : memref<1x64x8xf32, #tpu.memory_space<vmem>>, vector<1x64x8xf32>,
    return
  }
  func.func @transform_0(%arg0: i32) -> (i32, i32) {
    %c0_i32 = arith.constant 0 : i32
    %c0_i32_0 = arith.constant 0 : i32
    %c0_i32_1 = arith.constant 0 : i32
    return %c0_i32, %c0_i32_0 : i32, i32
  }
  func.func @transform_1(%arg0: i32) -> (i32, i32) {
    %c0_i32 = arith.constant 0 : i32
    %c0_i32_0 = arith.constant 0 : i32
    return %c0_i32, %arg0 : i32, i32
  }
  func.func @transform_2(%arg0: i32) -> (i32, i32) {
    %c0_i32 = arith.constant 0 : i32
    %c0_i32_0 = arith.constant 0 : i32
    return %c0_i32, %arg0 : i32, i32
  }
  func.func @transform_3(%arg0: i32) -> (i32, i32, i32) {
    %c0_i32 = arith.constant 0 : i32
    %c0_i32_0 = arith.constant 0 : i32
    %c0_i32_1 = arith.constant 0 : i32
    return %arg0, %c0_i32, %c0_i32_0 : i32, i32, i32
  }
  func.func @transform_4(%arg0: i32) -> (i32, i32, i32) {
    %c0_i32 = arith.constant 0 : i32
    %c0_i32_0 = arith.constant 0 : i32
    %c0_i32_1 = arith.constant 0 : i32
    return %arg0, %c0_i32, %c0_i32_0 : i32, i32, i32
  }
}

module attributes {stable_mosaic.version = 11 : i64} {
  func.func @_bn_relu_kernel(%arg0: i32, %arg1: memref<64x256xf32, #tpu.memory_space<vmem>>, %arg2: memref<64x1xf32, #tpu.memory_space<vmem>>, %arg3: memref<64x1xf32, #tpu.memory_space<vmem>>, %arg4: memref<64x256xf32, #tpu.memory_space<vmem>>) attributes {dimension_semantics = [#tpu.dimension_semantics<parallel>], iteration_bounds = array<i64: 2>, scalar_prefetch = 0 : i64, scratch_operands = 0 : i64, tpu.core_type = #tpu.core_type<tc>, window_params = [{transform_indices = @transform_0, window_bounds = array<i64: 64, 256>}, {pipeline_mode = #tpu.pipeline_mode<synchronous>, transform_indices = @transform_1, window_bounds = array<i64: 64, 1>}, {pipeline_mode = #tpu.pipeline_mode<synchronous>, transform_indices = @transform_2, window_bounds = array<i64: 64, 1>}, {transform_indices = @transform_3, window_bounds = array<i64: 64, 256>}]} {
    %c0 = arith.constant 0 : index
    %c0_0 = arith.constant 0 : index
    %0 = vector.load %arg1[%c0, %c0_0] : memref<64x256xf32, #tpu.memory_space<vmem>>, vector<64x256xf32>
    %c0_1 = arith.constant 0 : index
    %c0_2 = arith.constant 0 : index
    %1 = vector.load %arg2[%c0_1, %c0_2] : memref<64x1xf32, #tpu.memory_space<vmem>>, vector<64x1xf32>
    %2 = vector.broadcast %1 : vector<64x1xf32> to vector<64x256xf32>
    %3 = arith.mulf %0, %2 : vector<64x256xf32>
    %c0_3 = arith.constant 0 : index
    %c0_4 = arith.constant 0 : index
    %4 = vector.load %arg3[%c0_3, %c0_4] : memref<64x1xf32, #tpu.memory_space<vmem>>, vector<64x1xf32>
    %5 = vector.broadcast %4 : vector<64x1xf32> to vector<64x256xf32>
    %6 = arith.addf %3, %5 : vector<64x256xf32>
    %cst = arith.constant 0.000000e+00 : f32
    %7 = vector.broadcast %cst : f32 to vector<64x256xf32>
    %8 = arith.maximumf %6, %7 : vector<64x256xf32>
    %c0_5 = arith.constant 0 : index
    %c0_6 = arith.constant 0 : index
    %9 = vector.load %arg4[%c0_5, %c0_6] : memref<64x256xf32, #tpu.memory_space<vmem>>, vector<64x256xf32>
    tpu.vector_store %arg4[%c0_5, %c0_6], %8 {strides = array<i32>} : memref<64x256xf32, #tpu.memory_space<vmem>>, vector<64x256xf32>,
    return
  }
  func.func @transform_0(%arg0: i32) -> (i32, i32) {
    %c0_i32 = arith.constant 0 : i32
    %c0_i32_0 = arith.constant 0 : i32
    return %c0_i32, %arg0 : i32, i32
  }
  func.func @transform_1(%arg0: i32) -> (i32, i32) {
    %c0_i32 = arith.constant 0 : i32
    %c0_i32_0 = arith.constant 0 : i32
    %c0_i32_1 = arith.constant 0 : i32
    return %c0_i32, %c0_i32_0 : i32, i32
  }
  func.func @transform_2(%arg0: i32) -> (i32, i32) {
    %c0_i32 = arith.constant 0 : i32
    %c0_i32_0 = arith.constant 0 : i32
    %c0_i32_1 = arith.constant 0 : i32
    return %c0_i32, %c0_i32_0 : i32, i32
  }
  func.func @transform_3(%arg0: i32) -> (i32, i32) {
    %c0_i32 = arith.constant 0 : i32
    %c0_i32_0 = arith.constant 0 : i32
    return %c0_i32, %arg0 : i32, i32
  }
}

</mosaic_0001>

<bundles_post_ra>
// kernel: resblock_forward.5
= control target key start
LH: loop header
LB: loop body
LE: loop exit
PB: predicated region body
PF: predicated region fallthrough
CT: control target
= control target key end

     0   :  { %s415_s12 = smov 0   ;;  %s417_s13 = smov 0   ;;  %s487_s0 = inlined_call_operand.vmem [shape: f32[16,512], index: 0, kind: input, shape index: {}]   ;;  %s488_s1 = inlined_call_operand.vmem [shape: f32[16,1], index: 1, kind: input, shape index: {}]   ;;  %s489_s2 = inlined_call_operand.vmem [shape: f32[16,1], index: 2, kind: input, shape index: {}]   ;;  %s490_s3 = inlined_call_operand.vmem [shape: f32[16,512], index: 3, kind: output, shape index: {}]  }
   0x1   :  { %s419_s14 = smov 0  }
   0x2 LB: > { %s326_s15 = sadd.s32 4294967295, %s392_s14   ;;  %s432_s16 = sadd.s32 1, %s392_s14   ;;  %s392_s14 = sphi %s419_s14, %s494_s14   ;;  %s388_s13 = sphi %s417_s13, %s493_s13   ;;  %s384_s12 = sphi %s415_s12, %s492_s12  }
   0x3   : > { %s17_s17 = ssub.s32 %s392_s14, %s432_s16  ;;  %s20_s18 = sadd.s32 1, %s388_s13 }
   0x4   : > { %p18_p0 = scmp.eq.s32.totalorder %s17_s17, 0  ;;  %p27_p1 = scmp.ne.s32.totalorder %s388_s13, %s384_s12 }
   0x5   : > { %p28_p2 = scmp.eq.s32.totalorder %s392_s14, 0  ;;  %p99_p3 = scmp.eq.s32.totalorder %s326_s15, 1 }
   0x6   : > { %s443_s19 = scalar_select %p18_p0, %s388_s13, %s20_s18  }
   0x7   : > { %p29_p4 = por %p28_p2, %p27_p1  ;;  %p445_p5 = por %p99_p3, %p27_p1 }
   0x8   : > { %p329_p6 = scmp.ge.s32.totalorder %s392_s14, 2 }
   0xa   : > { %127 = sbr.rel (%p329_p6) target bundleno = 24 (0x18), region = 24 }
  0x11   : > { %130 = sbr.rel (!%p29_p4) target bundleno = 24 (0x18), region = 28  ;;  %s132_s21 = sand.u32 (%p29_p4), 1, %s388_s13  }
  0x12   : > { %s341_s22 = sshll.u32 (%p29_p4), %s392_s14, 4  ;;  %s330_s23 = sshll.u32 (%p29_p4), %s132_s21, 5 }
  0x13   : > { %s137_s26 = scalar_lea.vmem (%p29_p4), %s487_s0, %s341_s22  ;;  %s134_s27 = scalar_lea.vmem (%p29_p4), [#allocation2], %s330_s23 }
  0x14   : > { %v150_v0 = vld [vmem:[%s137_s26] sm:$0xff] (%p29_p4)  ;;  %v152_v1 = vld [vmem:[%s137_s26 + $0x8] sm:$0xff] (%p29_p4) }
  0x15   : > { %v154_v2 = vld [vmem:[%s137_s26 + $0x20] sm:$0xff] (%p29_p4)  ;;  %151 = vst [vmem:[%s134_s27] sm:$0xff] (%p29_p4), %v150_v0  ;;  %153 = vst [vmem:[%s134_s27 + $0x8] sm:$0xff] (%p29_p4), %v152_v1  ;;  %v156_v3 = vld [vmem:[%s137_s26 + $0x28] sm:$0xff] (%p29_p4) }
  0x16   : > { %155 = vst [vmem:[%s134_s27 + $0x10] sm:$0xff] (%p29_p4), %v154_v2  ;;  %157 = vst [vmem:[%s134_s27 + $0x18] sm:$0xff] (%p29_p4), %v156_v3 }
  0x18 PF: > { %p333_p7 = scmp.ge.s32.totalorder %s392_s14, 1  ;;  %p162_p8 = scmp.lt.s32.totalorder %s392_s14, 3 }
  0x1a   : > { %p163_p9 = pnand %p333_p7, %p162_p8 }
  0x1b   : > { %v213_v4 = vld [vmem:[%s489_s2] sm:$0xff] (!%p163_p9)  ;;  %v394_v6 = vmov (!%p163_p9), 0   ;;  %v214_v7 = vld [vmem:[%s489_s2 + $0x8] sm:$0xff] (!%p163_p9)  ;;  %s169_s9 = sand.u32 (!%p163_p9), 1, %s384_s12  }
  0x1c   : > { %166 = sbr.rel (%p163_p9) target bundleno = 176 (0xb0), region = 51  ;;  %v197_v5 = vld [vmem:[%s488_s1] sm:$0xff] (!%p163_p9)  ;;  %369 = vset.pattern.permute.xlu1 (!%p163_p9), %v394_v6  ;;  %368 = vset.pattern.permute.xlu0 (!%p163_p9), %v394_v6  ;;  %v198_v8 = vld [vmem:[%s488_s1 + $0x8] sm:$0xff] (!%p163_p9)  ;;  %s334_s10 = sshll.u32 (!%p163_p9), %s169_s9, 5 }
  0x1d   : > { %217 = vperm.xlu1 (!%p163_p9), %369, %v213_v4   ;;  %201 = vperm.xlu0 (!%p163_p9), %368, %v197_v5   ;;  %s171_s11 = scalar_lea.vmem (!%p163_p9), [#allocation2], %s334_s10  ;;  %s190_s17 = scalar_lea.vmem (!%p163_p9), [#allocation3], %s334_s10 }
  0x1e   : > { %v193_v9 = vld [vmem:[%s171_s11] sm:$0xff] (!%p163_p9)  ;;  %v194_v10 = vld [vmem:[%s171_s11 + $0x8] sm:$0xff] (!%p163_p9)  ;;  %v195_v15 = vld [vmem:[%s171_s11 + $0x10] sm:$0xff] (!%p163_p9) }
  0x1f   : > { %v196_v16 = vld [vmem:[%s171_s11 + $0x18] sm:$0xff] (!%p163_p9) }
  0x21   : > { %222 = vperm.xlu1 (!%p163_p9), %369, %v214_v7   ;;  %206 = vperm.xlu0 (!%p163_p9), %368, %v198_v8  }
  0x23   : > { %s342_s12 = sshll.u32 (%p445_p5), %s326_s15, 4 }
  0x24   : > { %s246_s22 = scalar_lea.vmem (%p445_p5), %s490_s3, %s342_s12 }
  0x9c   : > { %v218_v11 = vpop.permute.xlu1 %217  ;;  %v202_v12 = vpop.permute.xlu0 %201 }
  0x9d   : > { %v209_v13 = vmul.f32 %v202_v12, %v193_v9  ;;  %v210_v14 = vmul.f32 %v202_v12, %v194_v10 }
  0x9f   : > { %v225_v17 = vadd.f32 %v218_v11, %v209_v13  ;;  %v226_v18 = vadd.f32 %v218_v11, %v210_v14 }
  0xa0   : > { %v207_v19 = vpop.permute.xlu0 %206  ;;  %v223_v24 = vpop.permute.xlu1 %222 }
  0xa1   : > { %v229_v20 = vmax.f32 %v225_v17, 0.0  ;;  %v230_v21 = vmax.f32 %v226_v18, 0.0  ;;  %v211_v22 = vmul.f32 %v207_v19, %v195_v15  ;;  %v212_v23 = vmul.f32 %v207_v19, %v196_v16  ;;  %243 = sbr.rel (!%p445_p5) target bundleno = 176 (0xb0), region = 59 }
  0xa3   : > { %233 = vst [vmem:[%s190_s17] sm:$0xff] %v229_v20  ;;  %234 = vst [vmem:[%s190_s17 + $0x8] sm:$0xff] %v230_v21  ;;  %v227_v25 = vadd.f32 %v223_v24, %v211_v22  ;;  %v228_v26 = vadd.f32 %v223_v24, %v212_v23 }
  0xa5   : > { %v231_v27 = vmax.f32 %v227_v25, 0.0  ;;  %v232_v28 = vmax.f32 %v228_v26, 0.0 }
  0xa7   : > { %235 = vst [vmem:[%s190_s17 + $0x10] sm:$0xff] %v231_v27  ;;  %236 = vst [vmem:[%s190_s17 + $0x18] sm:$0xff] %v232_v28 }
  0xaa   : > { %v259_v29 = vld [vmem:[%s190_s17] sm:$0xff]  ;;  %v261_v30 = vld [vmem:[%s190_s17 + $0x8] sm:$0xff] }
  0xab   : > { %260 = vst [vmem:[%s246_s22] sm:$0xff] %v259_v29  ;;  %262 = vst [vmem:[%s246_s22 + $0x8] sm:$0xff] %v261_v30 }
  0xae   : > { %v263_v31 = vld [vmem:[%s190_s17 + $0x10] sm:$0xff]  ;;  %v265_v32 = vld [vmem:[%s190_s17 + $0x18] sm:$0xff] }
  0xaf   : > { %264 = vst [vmem:[%s246_s22 + $0x20] sm:$0xff] %v263_v31  ;;  %266 = vst [vmem:[%s246_s22 + $0x28] sm:$0xff] %v265_v32 }
  0xb0 PF: > { %p10_p10 = scmp.ge.s32.totalorder %s432_s16, 4   ;;  %s492_s12 = smov %s388_s13 }
  0xb1   : > { %s493_s13 = smov %s443_s19  ;;  %s494_s14 = smov %s432_s16 }
  0xb2   :  { %12 = sbr.rel (!%p10_p10) target bundleno = 2 (0x2), region = 113 }

// kernel: resblock_forward.4
= control target key start
LH: loop header
LB: loop body
LE: loop exit
PB: predicated region body
PF: predicated region fallthrough
CT: control target
= control target key end

     0   :  { %s1215_s15 = smov 0   ;;  %s1217_s16 = smov 0   ;;  %s1399_s0 = inlined_call_operand.vmem [shape: f32[16,27], index: 0, kind: input, shape index: {}]   ;;  %s1400_s1 = inlined_call_operand.vmem [shape: f32[27,512], index: 1, kind: input, shape index: {}]   ;;  %s1401_s2 = inlined_call_operand.vmem [shape: f32[16,512], index: 2, kind: output, shape index: {0}]   ;;  %s1402_s3 = inlined_call_operand.vmem [shape: f32[2,16,8], index: 3, kind: output, shape index: {1}]   ;;  %s1403_s4 = inlined_call_operand.vmem [shape: f32[2,16,8], index: 4, kind: output, shape index: {2}]  }
   0x1   :  { %s1219_s17 = smov 0  }
   0x2 LB: > { %s1231_s18 = sadd.s32 4294967295, %s1187_s17   ;;  %s1234_s19 = sadd.s32 1, %s1187_s17   ;;  %s1187_s17 = sphi %s1219_s17, %s1407_s17   ;;  %s1183_s16 = sphi %s1217_s16, %s1406_s16   ;;  %s1179_s15 = sphi %s1215_s15, %s1405_s15  }
   0x3   : > { %s40_s20 = ssub.s32 %s1187_s17, %s1234_s19  ;;  %s43_s21 = sadd.s32 1, %s1183_s16 }
   0x4   : > { %p41_p0 = scmp.eq.s32.totalorder %s40_s20, 0  ;;  %p50_p1 = scmp.ne.s32.totalorder %s1183_s16, %s1179_s15 }
   0x5   : > { %p51_p2 = scmp.eq.s32.totalorder %s1187_s17, 0  ;;  %p80_p3 = scmp.eq.s32.totalorder %s1231_s18, 1 }
   0x6   : > { %s1244_s22 = scalar_select %p41_p0, %s1183_s16, %s43_s21  }
   0x7   : > { %p52_p4 = por %p51_p2, %p50_p1  ;;  %p1246_p5 = por %p80_p3, %p50_p1 }
   0x8   : > { %p1052_p6 = scmp.ge.s32.totalorder %s1187_s17, 2 }
   0xa   : > { %157 = sbr.rel (%p1052_p6) target bundleno = 25 (0x19), region = 20 }
  0x11   : > { %160 = sbr.rel (!%p52_p4) target bundleno = 25 (0x19), region = 24  ;;  %s162_s24 = sand.u32 (%p52_p4), 1, %s1183_s16  }
  0x12   : > { %s1068_s25 = sshll.u32 (%p52_p4), %s1187_s17, 4  ;;  %s1053_s26 = sshll.u32 (%p52_p4), %s162_s24, 6 }
  0x13   : > { %s167_s29 = scalar_lea.vmem (%p52_p4), %s1400_s1, %s1068_s25  ;;  %s164_s30 = scalar_lea.vmem (%p52_p4), [#allocation2], %s1053_s26 }
  0x14   : > { %v180_v0 = vld [vmem:[%s167_s29] sm:$0xff] (%p52_p4)  ;;  %v182_v1 = vld [vmem:[%s167_s29 + $0x8] sm:$0xff] (%p52_p4) }
  0x15   : > { %v184_v2 = vld [vmem:[%s167_s29 + $0x20] sm:$0xff] (%p52_p4)  ;;  %181 = vst [vmem:[%s164_s30] sm:$0xff] (%p52_p4), %v180_v0  ;;  %183 = vst [vmem:[%s164_s30 + $0x8] sm:$0xff] (%p52_p4), %v182_v1  ;;  %v186_v3 = vld [vmem:[%s167_s29 + $0x28] sm:$0xff] (%p52_p4) }
  0x16   : > { %185 = vst [vmem:[%s164_s30 + $0x10] sm:$0xff] (%p52_p4), %v184_v2  ;;  %v188_v4 = vld [vmem:[%s167_s29 + $0x40] sm:$0xff] (%p52_p4)  ;;  %v190_v5 = vld [vmem:[%s167_s29 + $0x48] sm:$0xff] (%p52_p4)  ;;  %187 = vst [vmem:[%s164_s30 + $0x18] sm:$0xff] (%p52_p4), %v186_v3 }
  0x17   : > { %189 = vst [vmem:[%s164_s30 + $0x20] sm:$0xff] (%p52_p4), %v188_v4  ;;  %191 = vst [vmem:[%s164_s30 + $0x28] sm:$0xff] (%p52_p4), %v190_v5  ;;  %v192_v6 = vld [vmem:[%s167_s29 + $0x60] sm:$0xff] (%p52_p4)  ;;  %v194_v7 = vld [vmem:[%s167_s29 + $0x68] sm:$0xff] (%p52_p4) }
  0x18   : > { %193 = vst [vmem:[%s164_s30 + $0x30] sm:$0xff] %v192_v6  ;;  %195 = vst [vmem:[%s164_s30 + $0x38] sm:$0xff] %v194_v7 }
  0x19 PF: > { %p1056_p7 = scmp.ge.s32.totalorder %s1187_s17, 1  ;;  %p200_p8 = scmp.lt.s32.totalorder %s1187_s17, 3 }
  0x1b   : > { %p201_p9 = pnand %p1056_p7, %p200_p8 }
  0x1c   : > { %s207_s5 = sand.u32 (!%p201_p9), 1, %s1179_s15   ;;  %v253_v8 = vld [vmem:[%s1399_s0] sm:$0xff] (!%p201_p9)  ;;  %vm263_vm0 = vcmask (!%p201_p9), 220160   ;;  %v254_v9 = vld [vmem:[%s1399_s0 + $0x8] sm:$0xff] (!%p201_p9)  ;;  %v1189_v10 = vmov (!%p201_p9), 0.0   ;;  %vm270_vm1 = vcmask (!%p201_p9), 1042432  }
  0x1d   : > { %204 = sbr.rel (%p201_p9) target bundleno = 429 (0x1ad), region = 47  ;;  %s1057_s10 = sshll.u32 (!%p201_p9), %s207_s5, 6  ;;  %349 = vmatprep.mubr.f32.mxu1 (!%p201_p9), %v1189_v10  ;;  %660 = vmatprep.mubr.f32.mxu0 (!%p201_p9), %v1189_v10  ;;  %v265_v11 = vsel (!%p201_p9), %vm263_vm0, %v253_v8, 0  ;;  %v268_v12 = vsel (!%p201_p9), %vm263_vm0, %v254_v9, 0  ;;  %vm879_vm2 = vcmask (!%p201_p9), 64512  }
  0x1e   : > { %v1269_v13 = vand.u32 (!%p201_p9), 4294901760, %v265_v11  ;;  %v1271_v14 = vand.u32 (!%p201_p9), 4294901760, %v268_v12  ;;  %s209_s11 = scalar_lea.vmem (!%p201_p9), [#allocation2], %s1057_s10  ;;  %s1058_s12 = sshll.u32 (!%p201_p9), %s207_s5, 5 }
  0x1f   : > { %v256_v15 = vld [vmem:[%s209_s11 + $0x8] sm:$0xff] (!%p201_p9)  ;;  %v258_v16 = vld [vmem:[%s209_s11 + $0x18] sm:$0xff] (!%p201_p9)  ;;  %v255_v17 = vld [vmem:[%s209_s11] sm:$0xff] (!%p201_p9)  ;;  %s1365_s13 = scalar_lea.vmem (!%p201_p9), [#allocation3], %s1058_s12  ;;  %p243_p10 = scmp.lt.s32.totalorder (!%p201_p9), %s1231_s18, 1 }
  0x20   : > { %v277_v18 = vand.u32 (!%p201_p9), 4294901760, %v256_v15  ;;  %v281_v19 = vand.u32 (!%p201_p9), 4294901760, %v258_v16  ;;  %v257_v20 = vld [vmem:[%s209_s11 + $0x10] sm:$0xff] (!%p201_p9)  ;;  %v279_v21 = vand.u32 (!%p201_p9), 4294901760, %v255_v17  ;;  %v260_v22 = vld [vmem:[%s209_s11 + $0x28] sm:$0xff] (!%p201_p9)  ;;  %v259_v23 = vld [vmem:[%s209_s11 + $0x20] sm:$0xff] (!%p201_p9)  ;;  %v1274_v24 = vsub.f32 (!%p201_p9), %v265_v11, %v1269_v13 }
  0x21   : > { %v283_v25 = vand.u32 (!%p201_p9), 4294901760, %v257_v20  ;;  %v262_v26 = vld [vmem:[%s209_s11 + $0x38] sm:$0x7] (!%p201_p9)  ;;  %v285_v27 = vand.u32 (!%p201_p9), 4294901760, %v260_v22  ;;  %v261_v28 = vld [vmem:[%s209_s11 + $0x30] sm:$0x7] (!%p201_p9)  ;;  %v1277_v29 = vsub.f32 (!%p201_p9), %v268_v12, %v1271_v14 }
  0x22   : > { %v1279_v30 = vpack.c.bf16 (!%p201_p9), %v281_v19, %v277_v18  ;;  %v1281_v31 = vsub.f32 (!%p201_p9), %v256_v15, %v277_v18  ;;  %v1283_v32 = vsub.f32 (!%p201_p9), %v258_v16, %v281_v19  ;;  %v1285_v33 = vsub.f32 (!%p201_p9), %v255_v17, %v279_v21 }
  0x23   : > { %v1287_v34 = vpack.c.bf16 (!%p201_p9), %v283_v25, %v279_v21  ;;  %v1289_v35 = vsub.f32 (!%p201_p9), %v257_v20, %v283_v25  ;;  %v275_v36 = vsel (!%p201_p9), %vm270_vm1, %v262_v26, 0  ;;  %v1292_v37 = vsub.f32 (!%p201_p9), %v260_v22, %v285_v27 }
  0x24   : > { %1073 = vmatprep.subr.bf16.mxu1 %v1279_v30  ;;  %1097 = vmatprep.subr.bf16.mxu0 %v1279_v30  ;;  %v289_v38 = vand.u32 4294901760, %v275_v36  ;;  %v272_v39 = vsel %vm270_vm1, %v261_v28, 0  ;;  %v287_v40 = vand.u32 4294901760, %v259_v23  ;;  %v352_v41 = vand.u32 4294901760, %v1274_v24  ;;  %s244_s14 = scalar_select %p243_p10, %s1231_s18, 1 }
  0x25   : > { %1075 = vmatpush1.bf16.msra.mxu1 %v1287_v34  ;;  %1099 = vmatpush1.bf16.msra.mxu0 %v1287_v34  ;;  %v291_v42 = vand.u32 4294901760, %v272_v39  ;;  %v374_v43 = vand.u32 4294901760, %v1281_v31  ;;  %v386_v44 = vand.u32 4294901760, %v1283_v32  ;;  %v380_v45 = vand.u32 4294901760, %v1285_v33  ;;  %s1071_s27 = sshll.u32 (%p1246_p5), %s1231_s18, 4 }
  0x26   : > { %v1303_v46 = vpack.c.bf16 %v289_v38, %v285_v27  ;;  %v1305_v47 = vsub.f32 %v275_v36, %v289_v38  ;;  %v1307_v48 = vsub.f32 %v259_v23, %v287_v40  ;;  %v353_v49 = vsub.f32 %v1274_v24, %v352_v41  ;;  %s1069_s15 = sshll.u32 %s244_s14, 4  ;;  %s913_s30 = scalar_lea.vmem (%p1246_p5), %s1401_s2, %s1071_s27 }
  0x27   : > { %v1310_v50 = vpack.c.bf16 %v291_v42, %v287_v40  ;;  %v1312_v51 = vsub.f32 %v272_v39, %v291_v42  ;;  %v375_v52 = vsub.f32 %v1281_v31, %v374_v43  ;;  %v387_v53 = vsub.f32 %v1283_v32, %v386_v44  ;;  %s247_s21 = scalar_lea.vmem %s1402_s3, %s1069_s15  ;;  %s252_s26 = scalar_lea.vmem %s1403_s4, %s1069_s15 }
  0x28   : > { %1077 = vmatprep.subr.bf16.mxu1 %v1303_v46  ;;  %1101 = vmatprep.subr.bf16.mxu0 %v1303_v46  ;;  %v354_v54 = vand.u32 4294901760, %v353_v49  ;;  %v1104_v55 = vpack.c.bf16 %v386_v44, %v374_v43  ;;  %v381_v56 = vsub.f32 %v1285_v33, %v380_v45  ;;  %v392_v57 = vand.u32 4294901760, %v1289_v35 }
  0x29   : > { %1079 = vmatpush1.bf16.msra.mxu1 %v1310_v50  ;;  %1103 = vmatpush1.bf16.msra.mxu0 %v1310_v50  ;;  %v376_v58 = vand.u32 4294901760, %v375_v52  ;;  %v388_v59 = vand.u32 4294901760, %v387_v53  ;;  %v363_v60 = vand.u32 4294901760, %v1277_v29  ;;  %v398_v61 = vand.u32 4294901760, %v1292_v37 }
  0x2a   : > { %1105 = vmatprep.subr.bf16.mxu0 %v1104_v55  ;;  %v382_v62 = vand.u32 4294901760, %v381_v56  ;;  %v393_v63 = vsub.f32 %v1289_v35, %v392_v57  ;;  %v1106_v0 = vpack.c.bf16 %v392_v57, %v380_v45  ;;  %v410_v1 = vand.u32 4294901760, %v1305_v47 }
  0x2b   : > { %v1080_v2 = vpack.c.bf16 %v388_v59, %v376_v58  ;;  %v364_v3 = vsub.f32 %v1277_v29, %v363_v60  ;;  %v399_v4 = vsub.f32 %v1292_v37, %v398_v61  ;;  %v404_v5 = vand.u32 4294901760, %v1307_v48 }
  0x2c   : > { %355 = vmatmul.mubr.f32.vlgmr.msra.gmra.mrb[0].mxu1 %v354_v54  ;;  %664 = vmatmul.mubr.f32.vlgmr.msra.gmra.mrb[0].mxu0 %v352_v41  ;;  %v394_v6 = vand.u32 4294901760, %v393_v63  ;;  %v411_v7 = vsub.f32 %v1305_v47, %v410_v1  ;;  %v1108_v8 = vpack.c.bf16 %v410_v1, %v398_v61  ;;  %v416_v9 = vand.u32 4294901760, %v1312_v51 }
  0x2d   : > { %1081 = vmatprep.subr.bf16.mxu1 %v1080_v2  ;;  %1107 = vmatpush1.bf16.msra.mxu0 %v1106_v0  ;;  %v365_v11 = vand.u32 4294901760, %v364_v3  ;;  %v400_v12 = vand.u32 4294901760, %v399_v4  ;;  %v405_v15 = vsub.f32 %v1307_v48, %v404_v5  ;;  %v1088_v23 = vpack.c.bf16 %v1283_v32, %v1281_v31 }
  0x2e   : > { %v1082_v16 = vpack.c.bf16 %v394_v6, %v382_v62  ;;  %360 = vmatprep.mubr.f32.mxu1 %v1189_v10  ;;  %669 = vmatprep.mubr.f32.mxu0 %v1189_v10  ;;  %v412_v17 = vand.u32 4294901760, %v411_v7  ;;  %v417_v18 = vsub.f32 %v1312_v51, %v416_v9  ;;  %v1110_v19 = vpack.c.bf16 %v416_v9, %v404_v5 }
  0x2f   : > { %1109 = vmatprep.subr.bf16.mxu0 %v1108_v8  ;;  %v406_v20 = vand.u32 4294901760, %v405_v15  ;;  %v1090_v26 = vpack.c.bf16 %v1289_v35, %v1285_v33  ;;  %v1092_v27 = vpack.c.bf16 %v1305_v47, %v1292_v37  ;;  %v1094_v28 = vpack.c.bf16 %v1312_v51, %v1307_v48 }
  0x30   : > { %1083 = vmatpush1.bf16.msra.mxu1 %v1082_v16  ;;  %v1084_v21 = vpack.c.bf16 %v412_v17, %v400_v12  ;;  %673 = vmatmul.mubr.f32.gmra.mrb[2].mxu0 %v363_v60  ;;  %v418_v22 = vand.u32 4294901760, %v417_v18 }
  0x31   : > { %366 = vmatmul.mubr.f32.gmra.mrb[2].mxu1 %v365_v11  ;;  %1111 = vmatpush1.bf16.msra.mxu0 %v1110_v19 }
  0x32   : > { %1085 = vmatprep.subr.bf16.mxu1 %v1084_v21  ;;  %v1086_v25 = vpack.c.bf16 %v418_v22, %v406_v20  ;;  %476 = vmatprep.mubr.f32.mxu1 %v1189_v10 }
  0x33   : > { %767 = vmatprep.mubr.f32.mxu0 %v1189_v10  ;;  %1113 = vmatprep.subr.bf16.mxu0 %v1279_v30 }
  0x34   : > { %1087 = vmatpush1.bf16.msra.mxu1 %v1086_v25  ;;  %769 = vmatmul.mubr.f32.vlgmr.msra.gmra.mrb[0].mxu0 %v1269_v13 }
  0x35   : > { %1089 = vmatprep.subr.bf16.mxu1 %v1088_v23  ;;  %1115 = vmatpush1.bf16.msra.mxu0 %v1287_v34 }
  0x36   : > { %774 = vmatprep.mubr.f32.mxu0 %v1189_v10  ;;  %1117 = vmatprep.subr.bf16.mxu0 %v1303_v46 }
  0x37   : > { %478 = vmatmul.mubr.f32.vlgmr.msra.gmra.mrb[0].mxu1 %v1269_v13 }
  0x38   : > { %1091 = vmatpush1.bf16.msra.mxu1 %v1090_v26  ;;  %483 = vmatprep.mubr.f32.mxu1 %v1189_v10 }
  0x39   : > { %1093 = vmatprep.subr.bf16.mxu1 %v1092_v27  ;;  %776 = vmatmul.mubr.f32.gmra.mrb[2].mxu0 %v1271_v14 }
  0x3a   : > { %1119 = vmatpush1.bf16.msra.mxu0 %v1310_v50  ;;  %854 = vmatprep.mubr.f32.mxu0 %v1189_v10 }
  0x3b   : > { %485 = vmatmul.mubr.f32.gmra.mrb[2].mxu1 %v1271_v14 }
  0x3c   : > { %1095 = vmatpush1.bf16.msra.mxu1 %v1094_v28  ;;  %571 = vmatprep.mubr.f32.mxu1 %v1189_v10 }
  0x3d   : > { %856 = vmatmul.mubr.f32.vlgmr.msra.gmra.mrb[0].mxu0 %v1269_v13 }
  0x3e   : > { %861 = vmatprep.mubr.f32.mxu0 %v1189_v10 }
  0x3f   : > { %574 = vmatmul.mubr.f32.vlgmr.msra.gmra.mrb[0].mxu1 %v1274_v24 }
  0x40   : > { %579 = vmatprep.mubr.f32.mxu1 %v1189_v10 }
  0x41   : > { %863 = vmatmul.mubr.f32.gmra.mrb[2].mxu0 %v1271_v14 }
  0x43   : > { %582 = vmatmul.mubr.f32.gmra.mrb[2].mxu1 %v1277_v29 }
 0x110   : > { %v857_v30 = vpop.f32.mrb[0].mxu0 }
 0x111   : > { %v859_v31 = vpop.f32.mrb[1].mxu0 }
 0x112   : > { %v575_v32 = vpop.f32.mrb[0].mxu1 }
 0x113   : > { %v1120_v33 = vadd.f32 %v857_v30, %v575_v32  ;;  %v577_v34 = vpop.f32.mrb[1].mxu1 }
 0x114   : > { %v1121_v35 = vadd.f32 %v859_v31, %v577_v34  ;;  %v864_v36 = vpop.f32.mrb[2].mxu0 }
 0x115   : > { %869 = vst [vmem:[%s1365_s13] sm:$0xff] %v1120_v33  ;;  %v866_v10 = vpop.f32.mrb[3].mxu0  ;;  %v882_v13 = vmul.f32 %v1120_v33, %v1120_v33 }
 0x116   : > { %870 = vst [vmem:[%s1365_s13 + $0x8] sm:$0xff] %v1121_v35  ;;  %v583_v14 = vpop.f32.mrb[2].mxu1  ;;  %v873_v24 = vadd.f32 %v1121_v35, %v1120_v33  ;;  %v883_v29 = vmul.f32 %v1121_v35, %v1121_v35 }
 0x117   : > { %v1122_v37 = vadd.f32 %v864_v36, %v583_v14  ;;  %v585_v38 = vpop.f32.mrb[3].mxu1 }
 0x118   : > { %v1123_v39 = vadd.f32 %v866_v10, %v585_v38  ;;  %874 = vadd.xlane.f32.xlu0 %v873_v24  ;;  %v886_v40 = vadd.f32 %v883_v29, %v882_v13 }
 0x119   : > { %871 = vst [vmem:[%s1365_s13 + $0x10] sm:$0xff] %v1122_v37  ;;  %v884_v41 = vmul.f32 %v1122_v37, %v1122_v37 }
 0x11a   : > { %872 = vst [vmem:[%s1365_s13 + $0x18] sm:$0xff] %v1123_v39  ;;  %887 = vadd.xlane.f32.xlu1 %v886_v40  ;;  %v876_v42 = vadd.f32 %v1123_v39, %v1122_v37  ;;  %v885_v43 = vmul.f32 %v1123_v39, %v1123_v39 }
 0x11c   : > { %877 = vadd.xlane.f32.xlu0 %v876_v42  ;;  %v889_v44 = vadd.f32 %v885_v43, %v884_v41  ;;  %v926_v49 = vld [vmem:[%s1365_s13] sm:$0xff] (%p1246_p5) }
 0x11d   : > { %v928_v50 = vld [vmem:[%s1365_s13 + $0x8] sm:$0xff] (%p1246_p5)  ;;  %927 = vst [vmem:[%s913_s30] sm:$0xff] (%p1246_p5), %v926_v49 }
 0x11e   : > { %890 = vadd.xlane.f32.xlu1 %v889_v44  ;;  %929 = vst [vmem:[%s913_s30 + $0x8] sm:$0xff] (%p1246_p5), %v928_v50 }
 0x120   : > { %v930_v51 = vld [vmem:[%s1365_s13 + $0x10] sm:$0xff] (%p1246_p5) }
 0x121   : > { %v932_v52 = vld [vmem:[%s1365_s13 + $0x18] sm:$0xff] (%p1246_p5)  ;;  %931 = vst [vmem:[%s913_s30 + $0x20] sm:$0xff] (%p1246_p5), %v930_v51 }
 0x122   : > { %933 = vst [vmem:[%s913_s30 + $0x28] sm:$0xff] (%p1246_p5), %v932_v52 }
 0x1a5   : > { %v875_v45 = vpop.xlane.xlu0 %874 }
 0x1a6   : > { %880 = vst.msk [vmem:[%s247_s21] sm:$0xff] %vm879_vm2, %v875_v45  ;;  %910 = sbr.rel (!%p1246_p5) target bundleno = 429 (0x1ad), region = 55 }
 0x1a7   : > { %v888_v46 = vpop.xlane.xlu1 %887 }
 0x1a8   : > { %892 = vst.msk [vmem:[%s252_s26] sm:$0xff] %vm879_vm2, %v888_v46 }
 0x1a9   : > { %v878_v47 = vpop.xlane.xlu0 %877 }
 0x1aa   : > { %881 = vst.msk [vmem:[%s247_s21 + $0x8] sm:$0xff] %vm879_vm2, %v878_v47 }
 0x1ab   : > { %v891_v48 = vpop.xlane.xlu1 %890 }
 0x1ac   : > { %893 = vst.msk [vmem:[%s252_s26 + $0x8] sm:$0xff] %vm879_vm2, %v891_v48 }
 0x1ad PF: > { %p12_p11 = scmp.ge.s32.totalorder %s1234_s19, 4   ;;  %s1405_s15 = smov %s1183_s16 }
 0x1ae   : > { %s1406_s16 = smov %s1244_s22  ;;  %s1407_s17 = smov %s1234_s19 }
 0x1af   :  { %14 = sbr.rel (!%p12_p11) target bundleno = 2 (0x2), region = 133 }

// kernel: resblock_forward.7
= control target key start
LH: loop header
LB: loop body
LE: loop exit
PB: predicated region body
PF: predicated region fallthrough
CT: control target
= control target key end

     0   :  { %s595_s12 = smov 0   ;;  %s597_s13 = smov 0   ;;  %s781_s0 = inlined_call_operand.vmem [shape: f32[64,512], index: 0, kind: input, shape index: {}]   ;;  %s782_s1 = inlined_call_operand.vmem [shape: f32[64,1], index: 1, kind: input, shape index: {}]   ;;  %s783_s2 = inlined_call_operand.vmem [shape: f32[64,1], index: 2, kind: input, shape index: {}]   ;;  %s784_s3 = inlined_call_operand.vmem [shape: f32[64,512], index: 3, kind: output, shape index: {}]  }
   0x1   :  { %s599_s14 = smov 0  }
   0x2 LB: > { %s506_s15 = sadd.s32 4294967295, %s572_s14   ;;  %s612_s16 = sadd.s32 1, %s572_s14   ;;  %s572_s14 = sphi %s599_s14, %s788_s14   ;;  %s568_s13 = sphi %s597_s13, %s787_s13   ;;  %s564_s12 = sphi %s595_s12, %s786_s12  }
   0x3   : > { %s17_s17 = ssub.s32 %s572_s14, %s612_s16  ;;  %s20_s18 = sadd.s32 1, %s568_s13 }
   0x4   : > { %p18_p0 = scmp.eq.s32.totalorder %s17_s17, 0  ;;  %p27_p1 = scmp.ne.s32.totalorder %s568_s13, %s564_s12 }
   0x5   : > { %p28_p2 = scmp.eq.s32.totalorder %s572_s14, 0  ;;  %p99_p3 = scmp.eq.s32.totalorder %s506_s15, 1 }
   0x6   : > { %s623_s19 = scalar_select %p18_p0, %s568_s13, %s20_s18  }
   0x7   : > { %p29_p4 = por %p28_p2, %p27_p1  ;;  %p625_p5 = por %p99_p3, %p27_p1 }
   0x8   : > { %p509_p6 = scmp.ge.s32.totalorder %s572_s14, 2 }
   0xa   : > { %127 = sbr.rel (%p509_p6) target bundleno = 29 (0x1d), region = 24 }
  0x11   : > { %130 = sbr.rel (!%p29_p4) target bundleno = 29 (0x1d), region = 28  ;;  %s132_s21 = sand.u32 (%p29_p4), 1, %s568_s13  }
  0x12   : > { %s521_s22 = sshll.u32 (%p29_p4), %s572_s14, 4  ;;  %s510_s23 = sshll.u32 (%p29_p4), %s132_s21, 7 }
  0x13   : > { %s635_s26 = scalar_lea.vmem (%p29_p4), %s781_s0, %s521_s22  ;;  %s134_s27 = scalar_lea.vmem (%p29_p4), [#allocation2], %s510_s23 }
  0x14   : > { %v150_v0 = vld [vmem:[%s635_s26] sm:$0xff] (%p29_p4)  ;;  %v152_v1 = vld [vmem:[%s635_s26 + $0x8] sm:$0xff] (%p29_p4) }
  0x15   : > { %v154_v2 = vld [vmem:[%s635_s26 + $0x20] sm:$0xff] (%p29_p4)  ;;  %151 = vst [vmem:[%s134_s27] sm:$0xff] (%p29_p4), %v150_v0  ;;  %153 = vst [vmem:[%s134_s27 + $0x8] sm:$0xff] (%p29_p4), %v152_v1  ;;  %v156_v3 = vld [vmem:[%s635_s26 + $0x28] sm:$0xff] (%p29_p4) }
  0x16   : > { %155 = vst [vmem:[%s134_s27 + $0x10] sm:$0xff] (%p29_p4), %v154_v2  ;;  %v158_v4 = vld [vmem:[%s635_s26 + $0x40] sm:$0xff] (%p29_p4)  ;;  %v160_v5 = vld [vmem:[%s635_s26 + $0x48] sm:$0xff] (%p29_p4)  ;;  %157 = vst [vmem:[%s134_s27 + $0x18] sm:$0xff] (%p29_p4), %v156_v3 }
  0x17   : > { %159 = vst [vmem:[%s134_s27 + $0x20] sm:$0xff] (%p29_p4), %v158_v4  ;;  %161 = vst [vmem:[%s134_s27 + $0x28] sm:$0xff] (%p29_p4), %v160_v5  ;;  %v162_v6 = vld [vmem:[%s635_s26 + $0x60] sm:$0xff] (%p29_p4)  ;;  %v164_v7 = vld [vmem:[%s635_s26 + $0x68] sm:$0xff] (%p29_p4) }
  0x18   : > { %v166_v8 = vld [vmem:[%s635_s26 + $0x80] sm:$0xff]  ;;  %163 = vst [vmem:[%s134_s27 + $0x30] sm:$0xff] %v162_v6  ;;  %165 = vst [vmem:[%s134_s27 + $0x38] sm:$0xff] %v164_v7  ;;  %v168_v9 = vld [vmem:[%s635_s26 + $0x88] sm:$0xff] }
  0x19   : > { %167 = vst [vmem:[%s134_s27 + $0x40] sm:$0xff] %v166_v8  ;;  %v170_v10 = vld [vmem:[%s635_s26 + $0xa0] sm:$0xff]  ;;  %v172_v11 = vld [vmem:[%s635_s26 + $0xa8] sm:$0xff]  ;;  %169 = vst [vmem:[%s134_s27 + $0x48] sm:$0xff] %v168_v9 }
  0x1a   : > { %171 = vst [vmem:[%s134_s27 + $0x50] sm:$0xff] %v170_v10  ;;  %173 = vst [vmem:[%s134_s27 + $0x58] sm:$0xff] %v172_v11  ;;  %v174_v12 = vld [vmem:[%s635_s26 + $0xc0] sm:$0xff]  ;;  %v176_v13 = vld [vmem:[%s635_s26 + $0xc8] sm:$0xff] }
  0x1b   : > { %v178_v14 = vld [vmem:[%s635_s26 + $0xe0] sm:$0xff]  ;;  %175 = vst [vmem:[%s134_s27 + $0x60] sm:$0xff] %v174_v12  ;;  %177 = vst [vmem:[%s134_s27 + $0x68] sm:$0xff] %v176_v13  ;;  %v180_v15 = vld [vmem:[%s635_s26 + $0xe8] sm:$0xff] }
  0x1c   : > { %179 = vst [vmem:[%s134_s27 + $0x70] sm:$0xff] %v178_v14  ;;  %181 = vst [vmem:[%s134_s27 + $0x78] sm:$0xff] %v180_v15 }
  0x1d PF: > { %p513_p7 = scmp.ge.s32.totalorder %s572_s14, 1  ;;  %p186_p8 = scmp.lt.s32.totalorder %s572_s14, 3 }
  0x1f   : > { %p187_p9 = pnand %p513_p7, %p186_p8 }
  0x20   : > { %v235_v16 = vld [vmem:[%s782_s1 + $0x10] sm:$0xff] (!%p187_p9)  ;;  %v233_v17 = vld [vmem:[%s782_s1] sm:$0xff] (!%p187_p9)  ;;  %v574_v18 = vmov (!%p187_p9), 0   ;;  %v236_v19 = vld [vmem:[%s782_s1 + $0x18] sm:$0xff] (!%p187_p9)  ;;  %s193_s18 = sand.u32 (!%p187_p9), 1, %s564_s12  }
  0x21   : > { %190 = sbr.rel (%p187_p9) target bundleno = 204 (0xcc), region = 51  ;;  %549 = vset.pattern.permute.xlu1 (!%p187_p9), %v574_v18  ;;  %548 = vset.pattern.permute.xlu0 (!%p187_p9), %v574_v18  ;;  %v234_v20 = vld [vmem:[%s782_s1 + $0x8] sm:$0xff] (!%p187_p9)  ;;  %v237_v22 = vld [vmem:[%s782_s1 + $0x20] sm:$0xff] (!%p187_p9)  ;;  %v240_v23 = vld [vmem:[%s782_s1 + $0x38] sm:$0xff] (!%p187_p9)  ;;  %s704_s21 = sshll.u32 (!%p187_p9), %s193_s18, 7 }
  0x22   : > { %253 = vperm.xlu1 (!%p187_p9), %549, %v235_v16   ;;  %243 = vperm.xlu0 (!%p187_p9), %548, %v233_v17   ;;  %v238_v21 = vld [vmem:[%s782_s1 + $0x28] sm:$0xff] (!%p187_p9)  ;;  %v239_v24 = vld [vmem:[%s782_s1 + $0x30] sm:$0xff] (!%p187_p9)  ;;  %v297_v26 = vld [vmem:[%s783_s2] sm:$0xff] (!%p187_p9)  ;;  %s707_s22 = scalar_lea.vmem (!%p187_p9), [#allocation2], %s704_s21  ;;  %s724_s12 = scalar_lea.vmem (!%p187_p9), [#allocation3], %s704_s21 }
  0x23   : > { %v298_v25 = vld [vmem:[%s783_s2 + $0x8] sm:$0xff] (!%p187_p9)  ;;  %v300_v27 = vld [vmem:[%s783_s2 + $0x18] sm:$0xff] (!%p187_p9)  ;;  %v299_v28 = vld [vmem:[%s783_s2 + $0x10] sm:$0xff] (!%p187_p9) }
  0x24   : > { %v302_v29 = vld [vmem:[%s783_s2 + $0x28] sm:$0xff] (!%p187_p9)  ;;  %v301_v30 = vld [vmem:[%s783_s2 + $0x20] sm:$0xff] (!%p187_p9)  ;;  %v304_v31 = vld [vmem:[%s783_s2 + $0x38] sm:$0xff] (!%p187_p9) }
  0x25   : > { %v303_v32 = vld [vmem:[%s783_s2 + $0x30] sm:$0xff] (!%p187_p9)  ;;  %v217_v39 = vld [vmem:[%s707_s22] sm:$0xff] (!%p187_p9)  ;;  %v218_v40 = vld [vmem:[%s707_s22 + $0x8] sm:$0xff] (!%p187_p9) }
  0x26   : > { %258 = vperm.xlu1 (!%p187_p9), %549, %v236_v19   ;;  %248 = vperm.xlu0 (!%p187_p9), %548, %v234_v20   ;;  %v219_v41 = vld [vmem:[%s707_s22 + $0x10] sm:$0xff] (!%p187_p9)  ;;  %v220_v42 = vld [vmem:[%s707_s22 + $0x18] sm:$0xff] (!%p187_p9)  ;;  %v221_v45 = vld [vmem:[%s707_s22 + $0x20] sm:$0xff] (!%p187_p9) }
  0x27   : > { %v222_v46 = vld [vmem:[%s707_s22 + $0x28] sm:$0xff] (!%p187_p9)  ;;  %v223_v49 = vld [vmem:[%s707_s22 + $0x30] sm:$0xff] (!%p187_p9)  ;;  %v224_v50 = vld [vmem:[%s707_s22 + $0x38] sm:$0xff] (!%p187_p9) }
  0x28   : > { %v227_v63 = vld [vmem:[%s707_s22 + $0x50] sm:$0xff]  ;;  %v228_v0 = vld [vmem:[%s707_s22 + $0x58] sm:$0xff]  ;;  %v225_v1 = vld [vmem:[%s707_s22 + $0x40] sm:$0xff]  ;;  %s522_s23 = sshll.u32 (%p625_p5), %s506_s15, 4 }
  0x29   : > { %v226_v2 = vld [vmem:[%s707_s22 + $0x48] sm:$0xff]  ;;  %v231_v17 = vld [vmem:[%s707_s22 + $0x70] sm:$0xff]  ;;  %v232_v18 = vld [vmem:[%s707_s22 + $0x78] sm:$0xff]  ;;  %s402_s20 = scalar_lea.vmem (%p625_p5), %s784_s3, %s522_s23 }
  0x2a   : > { %268 = vperm.xlu1 %549, %v238_v21   ;;  %263 = vperm.xlu0 %548, %v237_v22   ;;  %v229_v19 = vld [vmem:[%s707_s22 + $0x60] sm:$0xff]  ;;  %v230_v20 = vld [vmem:[%s707_s22 + $0x68] sm:$0xff] }
  0x2e   : > { %278 = vperm.xlu1 %549, %v240_v23   ;;  %273 = vperm.xlu0 %548, %v239_v24  }
  0x32   : > { %312 = vperm.xlu1 %549, %v298_v25   ;;  %307 = vperm.xlu0 %548, %v297_v26  }
  0x36   : > { %322 = vperm.xlu1 %549, %v300_v27   ;;  %317 = vperm.xlu0 %548, %v299_v28  }
  0x3a   : > { %332 = vperm.xlu1 %549, %v302_v29   ;;  %327 = vperm.xlu0 %548, %v301_v30  }
  0x3e   : > { %342 = vperm.xlu1 %549, %v304_v31   ;;  %337 = vperm.xlu0 %548, %v303_v32  }
  0xa1   : > { %v254_v33 = vpop.permute.xlu1 %253  ;;  %v244_v34 = vpop.permute.xlu0 %243 }
  0xa2   : > { %v281_v47 = vmul.f32 %v244_v34, %v217_v39  ;;  %v282_v48 = vmul.f32 %v244_v34, %v218_v40  ;;  %v285_v59 = vmul.f32 %v254_v33, %v221_v45  ;;  %v286_v60 = vmul.f32 %v254_v33, %v222_v46 }
  0xa5   : > { %v259_v35 = vpop.permute.xlu1 %258  ;;  %v249_v36 = vpop.permute.xlu0 %248 }
  0xa6   : > { %v283_v51 = vmul.f32 %v249_v36, %v219_v41  ;;  %v284_v52 = vmul.f32 %v249_v36, %v220_v42  ;;  %v287_v61 = vmul.f32 %v259_v35, %v223_v49  ;;  %v288_v62 = vmul.f32 %v259_v35, %v224_v50 }
  0xa9   : > { %v269_v37 = vpop.permute.xlu1 %268  ;;  %v264_v38 = vpop.permute.xlu0 %263 }
  0xaa   : > { %v291_v13 = vmul.f32 %v269_v37, %v227_v63  ;;  %v292_v14 = vmul.f32 %v269_v37, %v228_v0  ;;  %v289_v15 = vmul.f32 %v264_v38, %v225_v1  ;;  %v290_v16 = vmul.f32 %v264_v38, %v226_v2 }
  0xad   : > { %v279_v43 = vpop.permute.xlu1 %278  ;;  %v713_v44 = vpop.permute.xlu0 %273 }
  0xae   : > { %v295_v31 = vmul.f32 %v279_v43, %v231_v17  ;;  %v296_v32 = vmul.f32 %v279_v43, %v232_v18  ;;  %v293_v33 = vmul.f32 %v713_v44, %v229_v19  ;;  %v294_v34 = vmul.f32 %v713_v44, %v230_v20 }
  0xb1   : > { %v313_v53 = vpop.permute.xlu1 %312  ;;  %v308_v54 = vpop.permute.xlu0 %307 }
  0xb2   : > { %v347_v55 = vadd.f32 %v313_v53, %v283_v51  ;;  %v348_v56 = vadd.f32 %v313_v53, %v284_v52  ;;  %v345_v57 = vadd.f32 %v308_v54, %v281_v47  ;;  %v346_v58 = vadd.f32 %v308_v54, %v282_v48 }
  0xb4   : > { %v363_v3 = vmax.f32 %v347_v55, 0.0  ;;  %v364_v4 = vmax.f32 %v348_v56, 0.0  ;;  %v361_v5 = vmax.f32 %v345_v57, 0.0  ;;  %v362_v6 = vmax.f32 %v346_v58, 0.0 }
  0xb5   : > { %v323_v7 = vpop.permute.xlu1 %322  ;;  %v318_v8 = vpop.permute.xlu0 %317 }
  0xb6   : > { %379 = vst [vmem:[%s724_s12 + $0x10] sm:$0xff] %v363_v3  ;;  %380 = vst [vmem:[%s724_s12 + $0x18] sm:$0xff] %v364_v4  ;;  %v351_v9 = vadd.f32 %v323_v7, %v287_v61  ;;  %v352_v10 = vadd.f32 %v323_v7, %v288_v62  ;;  %v349_v11 = vadd.f32 %v318_v8, %v285_v59 }
  0xb7   : > { %377 = vst [vmem:[%s724_s12] sm:$0xff] %v361_v5  ;;  %378 = vst [vmem:[%s724_s12 + $0x8] sm:$0xff] %v362_v6  ;;  %v350_v12 = vadd.f32 %v318_v8, %v286_v60 }
  0xb8   : > { %v367_v21 = vmax.f32 %v351_v9, 0.0  ;;  %v368_v22 = vmax.f32 %v352_v10, 0.0  ;;  %v365_v23 = vmax.f32 %v349_v11, 0.0 }
  0xb9   : > { %v366_v24 = vmax.f32 %v350_v12, 0.0  ;;  %v333_v25 = vpop.permute.xlu1 %332  ;;  %v328_v26 = vpop.permute.xlu0 %327 }
  0xba   : > { %383 = vst [vmem:[%s724_s12 + $0x30] sm:$0xff] %v367_v21  ;;  %384 = vst [vmem:[%s724_s12 + $0x38] sm:$0xff] %v368_v22  ;;  %v355_v27 = vadd.f32 %v333_v25, %v291_v13  ;;  %v356_v28 = vadd.f32 %v333_v25, %v292_v14  ;;  %v353_v29 = vadd.f32 %v328_v26, %v289_v15 }
  0xbb   : > { %381 = vst [vmem:[%s724_s12 + $0x20] sm:$0xff] %v365_v23  ;;  %382 = vst [vmem:[%s724_s12 + $0x28] sm:$0xff] %v366_v24  ;;  %v354_v30 = vadd.f32 %v328_v26, %v290_v16 }
  0xbc   : > { %v371_v35 = vmax.f32 %v355_v27, 0.0  ;;  %v372_v36 = vmax.f32 %v356_v28, 0.0  ;;  %v369_v37 = vmax.f32 %v353_v29, 0.0 }
  0xbd   : > { %v370_v38 = vmax.f32 %v354_v30, 0.0  ;;  %v343_v39 = vpop.permute.xlu1 %342  ;;  %v338_v40 = vpop.permute.xlu0 %337  ;;  %399 = sbr.rel (!%p625_p5) target bundleno = 204 (0xcc), region = 59  ;;  %v419_v51 = vld [vmem:[%s724_s12 + $0x10] sm:$0xff] (%p625_p5)  ;;  %v421_v52 = vld [vmem:[%s724_s12 + $0x18] sm:$0xff] (%p625_p5) }
  0xbe   : > { %387 = vst [vmem:[%s724_s12 + $0x50] sm:$0xff] %v371_v35  ;;  %388 = vst [vmem:[%s724_s12 + $0x58] sm:$0xff] %v372_v36  ;;  %v359_v41 = vadd.f32 %v343_v39, %v295_v31  ;;  %v360_v42 = vadd.f32 %v343_v39, %v296_v32  ;;  %v357_v43 = vadd.f32 %v338_v40, %v293_v33  ;;  %v415_v49 = vld [vmem:[%s724_s12] sm:$0xff] (%p625_p5)  ;;  %v417_v50 = vld [vmem:[%s724_s12 + $0x8] sm:$0xff] (%p625_p5) }
  0xbf   : > { %385 = vst [vmem:[%s724_s12 + $0x40] sm:$0xff] %v369_v37  ;;  %386 = vst [vmem:[%s724_s12 + $0x48] sm:$0xff] %v370_v38  ;;  %v358_v45 = vadd.f32 %v338_v40, %v294_v34 }
  0xc0   : > { %v375_v46 = vmax.f32 %v359_v41, 0.0  ;;  %v376_v44 = vmax.f32 %v360_v42, 0.0  ;;  %v373_v47 = vmax.f32 %v357_v43, 0.0  ;;  %416 = vst [vmem:[%s402_s20] sm:$0xff] (%p625_p5), %v415_v49  ;;  %418 = vst [vmem:[%s402_s20 + $0x8] sm:$0xff] (%p625_p5), %v417_v50 }
  0xc1   : > { %v374_v48 = vmax.f32 %v358_v45, 0.0  ;;  %420 = vst [vmem:[%s402_s20 + $0x20] sm:$0xff] (%p625_p5), %v419_v51  ;;  %422 = vst [vmem:[%s402_s20 + $0x28] sm:$0xff] (%p625_p5), %v421_v52  ;;  %v427_v55 = vld [vmem:[%s724_s12 + $0x30] sm:$0xff] (%p625_p5)  ;;  %v429_v56 = vld [vmem:[%s724_s12 + $0x38] sm:$0xff] (%p625_p5) }
  0xc2   : > { %391 = vst [vmem:[%s724_s12 + $0x70] sm:$0xff] %v375_v46  ;;  %392 = vst [vmem:[%s724_s12 + $0x78] sm:$0xff] %v376_v44  ;;  %v423_v53 = vld [vmem:[%s724_s12 + $0x20] sm:$0xff] (%p625_p5)  ;;  %v425_v54 = vld [vmem:[%s724_s12 + $0x28] sm:$0xff] (%p625_p5) }
  0xc3   : > { %389 = vst [vmem:[%s724_s12 + $0x60] sm:$0xff] %v373_v47  ;;  %390 = vst [vmem:[%s724_s12 + $0x68] sm:$0xff] %v374_v48 }
  0xc4   : > { %424 = vst [vmem:[%s402_s20 + $0x40] sm:$0xff] %v423_v53  ;;  %426 = vst [vmem:[%s402_s20 + $0x48] sm:$0xff] %v425_v54 }
  0xc5   : > { %428 = vst [vmem:[%s402_s20 + $0x60] sm:$0xff] %v427_v55  ;;  %430 = vst [vmem:[%s402_s20 + $0x68] sm:$0xff] %v429_v56  ;;  %v435_v59 = vld [vmem:[%s724_s12 + $0x50] sm:$0xff]  ;;  %v437_v60 = vld [vmem:[%s724_s12 + $0x58] sm:$0xff] }
  0xc6   : > { %v431_v57 = vld [vmem:[%s724_s12 + $0x40] sm:$0xff]  ;;  %v433_v58 = vld [vmem:[%s724_s12 + $0x48] sm:$0xff]  ;;  %436 = vst [vmem:[%s402_s20 + $0xa0] sm:$0xff] %v435_v59  ;;  %438 = vst [vmem:[%s402_s20 + $0xa8] sm:$0xff] %v437_v60 }
  0xc7   : > { %432 = vst [vmem:[%s402_s20 + $0x80] sm:$0xff] %v431_v57  ;;  %434 = vst [vmem:[%s402_s20 + $0x88] sm:$0xff] %v433_v58 }
  0xc9   : > { %v443_v63 = vld [vmem:[%s724_s12 + $0x70] sm:$0xff]  ;;  %v445_v0 = vld [vmem:[%s724_s12 + $0x78] sm:$0xff] }
  0xca   : > { %v439_v61 = vld [vmem:[%s724_s12 + $0x60] sm:$0xff]  ;;  %v441_v62 = vld [vmem:[%s724_s12 + $0x68] sm:$0xff]  ;;  %444 = vst [vmem:[%s402_s20 + $0xe0] sm:$0xff] %v443_v63  ;;  %446 = vst [vmem:[%s402_s20 + $0xe8] sm:$0xff] %v445_v0 }
  0xcb   : > { %440 = vst [vmem:[%s402_s20 + $0xc0] sm:$0xff] %v439_v61  ;;  %442 = vst [vmem:[%s402_s20 + $0xc8] sm:$0xff] %v441_v62 }
  0xcc PF: > { %p10_p10 = scmp.ge.s32.totalorder %s612_s16, 4   ;;  %s786_s12 = smov %s568_s13 }
  0xcd   : > { %s787_s13 = smov %s623_s19  ;;  %s788_s14 = smov %s612_s16 }
  0xce   :  { %12 = sbr.rel (!%p10_p10) target bundleno = 2 (0x2), region = 113 }

// kernel: resblock_forward.6
= control target key start
LH: loop header
LB: loop body
LE: loop exit
PB: predicated region body
PF: predicated region fallthrough
CT: control target
= control target key end

     0   :  { %s2408_s15 = smov 0   ;;  %s2410_s16 = smov 0   ;;  %s3198_s0 = inlined_call_operand.vmem [shape: f32[64,144], index: 0, kind: input, shape index: {}]   ;;  %s3199_s1 = inlined_call_operand.vmem [shape: f32[144,512], index: 1, kind: input, shape index: {}]   ;;  %s3200_s2 = inlined_call_operand.vmem [shape: f32[64,512], index: 2, kind: output, shape index: {0}]   ;;  %s3201_s3 = inlined_call_operand.vmem [shape: f32[2,64,8], index: 3, kind: output, shape index: {1}]   ;;  %s3202_s4 = inlined_call_operand.vmem [shape: f32[2,64,8], index: 4, kind: output, shape index: {2}]  }
   0x1   :  { %s2412_s17 = smov 0  }
   0x2 LB: > { %s2424_s18 = sadd.s32 4294967295, %s2381_s17   ;;  %s2427_s19 = sadd.s32 1, %s2381_s17   ;;  %s2381_s17 = sphi %s2412_s17, %s3348_s17   ;;  %s2377_s16 = sphi %s2410_s16, %s3347_s16   ;;  %s2373_s15 = sphi %s2408_s15, %s3346_s15  }
   0x3   : > { %s40_s20 = ssub.s32 %s2381_s17, %s2427_s19  ;;  %s43_s21 = sadd.s32 1, %s2377_s16 }
   0x4   : > { %p41_p0 = scmp.eq.s32.totalorder %s40_s20, 0  ;;  %p50_p1 = scmp.ne.s32.totalorder %s2377_s16, %s2373_s15 }
   0x5   : > { %p51_p2 = scmp.eq.s32.totalorder %s2381_s17, 0  ;;  %p80_p3 = scmp.eq.s32.totalorder %s2424_s18, 1 }
   0x6   : > { %s2437_s22 = scalar_select %p41_p0, %s2377_s16, %s43_s21  }
   0x7   : > { %p52_p4 = por %p51_p2, %p50_p1  ;;  %p2439_p5 = por %p80_p3, %p50_p1 }
   0x8   : > { %p2019_p6 = scmp.ge.s32.totalorder %s2381_s17, 2 }
   0xa   : > { %157 = sbr.rel (%p2019_p6) target bundleno = 39 (0x27), region = 20 }
  0x11   : > { %160 = sbr.rel (!%p52_p4) target bundleno = 39 (0x27), region = 24  ;;  %s162_s24 = sand.u32 (%p52_p4), 1, %s2377_s16  }
  0x12   : > { %s2033_s25 = sshll.u32 (%p52_p4), %s2381_s17, 4  ;;  %s2333_s26 = smul.u32 (%p52_p4), 288, %s162_s24 }
  0x13   : > { %s2449_s29 = scalar_lea.vmem (%p52_p4), %s3199_s1, %s2033_s25 }
  0x14   : > { %v180_v0 = vld [vmem:[%s2449_s29] sm:$0xff] (%p52_p4)  ;;  %v182_v1 = vld [vmem:[%s2449_s29 + $0x8] sm:$0xff] (%p52_p4)  ;;  %s2457_s30 = scalar_lea.vmem (%p52_p4), [#allocation2], %s2333_s26 }
  0x15   : > { %v184_v2 = vld [vmem:[%s2449_s29 + $0x20] sm:$0xff] (%p52_p4)  ;;  %v186_v3 = vld [vmem:[%s2449_s29 + $0x28] sm:$0xff] (%p52_p4)  ;;  %181 = vst [vmem:[%s2457_s30] sm:$0xff] (%p52_p4), %v180_v0  ;;  %183 = vst [vmem:[%s2457_s30 + $0x8] sm:$0xff] (%p52_p4), %v182_v1 }
  0x16   : > { %v188_v4 = vld [vmem:[%s2449_s29 + $0x40] sm:$0xff] (%p52_p4)  ;;  %v190_v5 = vld [vmem:[%s2449_s29 + $0x48] sm:$0xff] (%p52_p4)  ;;  %185 = vst [vmem:[%s2457_s30 + $0x10] sm:$0xff] (%p52_p4), %v184_v2  ;;  %187 = vst [vmem:[%s2457_s30 + $0x18] sm:$0xff] (%p52_p4), %v186_v3 }
  0x17   : > { %189 = vst [vmem:[%s2457_s30 + $0x20] sm:$0xff] (%p52_p4), %v188_v4  ;;  %191 = vst [vmem:[%s2457_s30 + $0x28] sm:$0xff] (%p52_p4), %v190_v5  ;;  %v192_v6 = vld [vmem:[%s2449_s29 + $0x60] sm:$0xff] (%p52_p4)  ;;  %v194_v7 = vld [vmem:[%s2449_s29 + $0x68] sm:$0xff] (%p52_p4) }
  0x18   : > { %v196_v8 = vld [vmem:[%s2449_s29 + $0x80] sm:$0xff]  ;;  %193 = vst [vmem:[%s2457_s30 + $0x30] sm:$0xff] %v192_v6  ;;  %195 = vst [vmem:[%s2457_s30 + $0x38] sm:$0xff] %v194_v7  ;;  %v198_v9 = vld [vmem:[%s2449_s29 + $0x88] sm:$0xff] }
  0x19   : > { %197 = vst [vmem:[%s2457_s30 + $0x40] sm:$0xff] %v196_v8  ;;  %v200_v10 = vld [vmem:[%s2449_s29 + $0xa0] sm:$0xff]  ;;  %v202_v11 = vld [vmem:[%s2449_s29 + $0xa8] sm:$0xff]  ;;  %199 = vst [vmem:[%s2457_s30 + $0x48] sm:$0xff] %v198_v9 }
  0x1a   : > { %201 = vst [vmem:[%s2457_s30 + $0x50] sm:$0xff] %v200_v10  ;;  %203 = vst [vmem:[%s2457_s30 + $0x58] sm:$0xff] %v202_v11  ;;  %v204_v12 = vld [vmem:[%s2449_s29 + $0xc0] sm:$0xff]  ;;  %v206_v13 = vld [vmem:[%s2449_s29 + $0xc8] sm:$0xff] }
  0x1b   : > { %v208_v14 = vld [vmem:[%s2449_s29 + $0xe0] sm:$0xff]  ;;  %205 = vst [vmem:[%s2457_s30 + $0x60] sm:$0xff] %v204_v12  ;;  %207 = vst [vmem:[%s2457_s30 + $0x68] sm:$0xff] %v206_v13  ;;  %v210_v15 = vld [vmem:[%s2449_s29 + $0xe8] sm:$0xff] }
  0x1c   : > { %209 = vst [vmem:[%s2457_s30 + $0x70] sm:$0xff] %v208_v14  ;;  %v212_v16 = vld [vmem:[%s2449_s29 + $0x100] sm:$0xff]  ;;  %v214_v17 = vld [vmem:[%s2449_s29 + $0x108] sm:$0xff]  ;;  %211 = vst [vmem:[%s2457_s30 + $0x78] sm:$0xff] %v210_v15 }
  0x1d   : > { %213 = vst [vmem:[%s2457_s30 + $0x80] sm:$0xff] %v212_v16  ;;  %215 = vst [vmem:[%s2457_s30 + $0x88] sm:$0xff] %v214_v17  ;;  %v216_v18 = vld [vmem:[%s2449_s29 + $0x120] sm:$0xff]  ;;  %v218_v19 = vld [vmem:[%s2449_s29 + $0x128] sm:$0xff] }
  0x1e   : > { %v220_v20 = vld [vmem:[%s2449_s29 + $0x140] sm:$0xff]  ;;  %217 = vst [vmem:[%s2457_s30 + $0x90] sm:$0xff] %v216_v18  ;;  %219 = vst [vmem:[%s2457_s30 + $0x98] sm:$0xff] %v218_v19  ;;  %v222_v21 = vld [vmem:[%s2449_s29 + $0x148] sm:$0xff] }
  0x1f   : > { %221 = vst [vmem:[%s2457_s30 + $0xa0] sm:$0xff] %v220_v20  ;;  %v224_v22 = vld [vmem:[%s2449_s29 + $0x160] sm:$0xff]  ;;  %v226_v23 = vld [vmem:[%s2449_s29 + $0x168] sm:$0xff]  ;;  %223 = vst [vmem:[%s2457_s30 + $0xa8] sm:$0xff] %v222_v21 }
  0x20   : > { %225 = vst [vmem:[%s2457_s30 + $0xb0] sm:$0xff] %v224_v22  ;;  %227 = vst [vmem:[%s2457_s30 + $0xb8] sm:$0xff] %v226_v23  ;;  %v228_v24 = vld [vmem:[%s2449_s29 + $0x180] sm:$0xff]  ;;  %v230_v25 = vld [vmem:[%s2449_s29 + $0x188] sm:$0xff] }
  0x21   : > { %v232_v26 = vld [vmem:[%s2449_s29 + $0x1a0] sm:$0xff]  ;;  %229 = vst [vmem:[%s2457_s30 + $0xc0] sm:$0xff] %v228_v24  ;;  %231 = vst [vmem:[%s2457_s30 + $0xc8] sm:$0xff] %v230_v25  ;;  %v234_v27 = vld [vmem:[%s2449_s29 + $0x1a8] sm:$0xff] }
  0x22   : > { %233 = vst [vmem:[%s2457_s30 + $0xd0] sm:$0xff] %v232_v26  ;;  %v236_v28 = vld [vmem:[%s2449_s29 + $0x1c0] sm:$0xff]  ;;  %v238_v29 = vld [vmem:[%s2449_s29 + $0x1c8] sm:$0xff]  ;;  %235 = vst [vmem:[%s2457_s30 + $0xd8] sm:$0xff] %v234_v27 }
  0x23   : > { %237 = vst [vmem:[%s2457_s30 + $0xe0] sm:$0xff] %v236_v28  ;;  %239 = vst [vmem:[%s2457_s30 + $0xe8] sm:$0xff] %v238_v29  ;;  %v240_v30 = vld [vmem:[%s2449_s29 + $0x1e0] sm:$0xff]  ;;  %v242_v31 = vld [vmem:[%s2449_s29 + $0x1e8] sm:$0xff] }
  0x24   : > { %v244_v32 = vld [vmem:[%s2449_s29 + $0x200] sm:$0xff]  ;;  %241 = vst [vmem:[%s2457_s30 + $0xf0] sm:$0xff] %v240_v30  ;;  %243 = vst [vmem:[%s2457_s30 + $0xf8] sm:$0xff] %v242_v31  ;;  %v246_v33 = vld [vmem:[%s2449_s29 + $0x208] sm:$0xff] }
  0x25   : > { %245 = vst [vmem:[%s2457_s30 + $0x100] sm:$0xff] %v244_v32  ;;  %v248_v34 = vld [vmem:[%s2449_s29 + $0x220] sm:$0xff]  ;;  %v250_v35 = vld [vmem:[%s2449_s29 + $0x228] sm:$0xff]  ;;  %247 = vst [vmem:[%s2457_s30 + $0x108] sm:$0xff] %v246_v33 }
  0x26   : > { %249 = vst [vmem:[%s2457_s30 + $0x110] sm:$0xff] %v248_v34  ;;  %251 = vst [vmem:[%s2457_s30 + $0x118] sm:$0xff] %v250_v35 }
  0x27 PF: > { %p2022_p7 = scmp.ge.s32.totalorder %s2381_s17, 1  ;;  %p256_p8 = scmp.lt.s32.totalorder %s2381_s17, 3 }
  0x29   : > { %p257_p9 = pnand %p2022_p7, %p256_p8 }
  0x2b   : > { %260 = sbr.rel (%p257_p9) target bundleno = 572 (0x23c), region = 47 }
  0x32   : > { %s263_s5 = sand.u32 1, %s2373_s15   ;;  %v310_v36 = vld [vmem:[%s3198_s0 + $0x8] sm:$0xff]  ;;  %vm361_vm0 = vcmask 130048   ;;  %v309_v37 = vld [vmem:[%s3198_s0] sm:$0xff]  ;;  %v312_v38 = vld [vmem:[%s3198_s0 + $0x18] sm:$0xff]  ;;  %p299_p10 = scmp.lt.s32.totalorder %s2424_s18, 1 }
  0x33   : > { %s2334_s12 = smul.u32 288, %s263_s5  ;;  %v363_v39 = vsel %vm361_vm0, %v310_v36, 0  ;;  %v2540_v40 = vand.u32 4294901760, %v309_v37  ;;  %v366_v41 = vsel %vm361_vm0, %v312_v38, 0  ;;  %v311_v42 = vld [vmem:[%s3198_s0 + $0x10] sm:$0xff]  ;;  %v314_v43 = vld [vmem:[%s3198_s0 + $0x28] sm:$0xff] }
  0x34   : > { %v2549_v44 = vand.u32 4294901760, %v363_v39  ;;  %v2551_v45 = vand.u32 4294901760, %v366_v41  ;;  %v2553_v46 = vand.u32 4294901760, %v311_v42  ;;  %v369_v47 = vsel %vm361_vm0, %v314_v43, 0  ;;  %v313_v48 = vld [vmem:[%s3198_s0 + $0x20] sm:$0xff]  ;;  %v316_v49 = vld [vmem:[%s3198_s0 + $0x38] sm:$0xff] }
  0x35   : > { %3256 = vst [vmem:[#allocation4_spill] sm:$0xff] %v2540_v40  ;;  %v2563_v50 = vsub.f32 %v309_v37, %v2540_v40  ;;  %v2565_v51 = vand.u32 4294901760, %v369_v47  ;;  %v2567_v52 = vand.u32 4294901760, %v313_v48  ;;  %v2570_v53 = vsel %vm361_vm0, %v316_v49, 0  ;;  %s2572_s27 = scalar_lea.vmem [#allocation2], %s2334_s12  ;;  %s2036_s10 = sshll.u32 (%p2439_p5), %s2424_s18, 4 }
  0x36   : > { %3257 = vst [vmem:[#allocation5_spill] sm:$0xff] %v2549_v44  ;;  %3258 = vst [vmem:[#allocation6_spill] sm:$0xff] %v2551_v45  ;;  %v326_v54 = vld [vmem:[%s2572_s27 + $0x8] sm:$0xff]  ;;  %v328_v55 = vld [vmem:[%s2572_s27 + $0x18] sm:$0xff]  ;;  %v2578_v57 = vsub.f32 %v363_v39, %v2549_v44  ;;  %v2581_v58 = vsub.f32 %v366_v41, %v2551_v45  ;;  %v2584_v59 = vsub.f32 %v311_v42, %v2553_v46  ;;  %v2587_v60 = vand.u32 4294901760, %v2570_v53  ;;  %s300_s15 = scalar_select %p299_p10, %s2424_s18, 1 }
  0x37   : > { %3259 = vst [vmem:[#allocation7_spill] sm:$0xff] %v2553_v46  ;;  %3260 = vst [vmem:[#allocation8_spill] sm:$0xff] %v2565_v51  ;;  %v325_v56 = vld [vmem:[%s2572_s27] sm:$0xff]  ;;  %v386_v61 = vand.u32 4294901760, %v326_v54  ;;  %v390_v62 = vand.u32 4294901760, %v328_v55  ;;  %v327_v63 = vld [vmem:[%s2572_s27 + $0x10] sm:$0xff]  ;;  %v2593_v3 = vsub.f32 %v369_v47, %v2565_v51  ;;  %v2599_v10 = vsub.f32 %v313_v48, %v2567_v52  ;;  %s1856_s13 = scalar_lea.vmem (%p2439_p5), %s3200_s2, %s2036_s10 }
  0x38   : > { %3261 = vst [vmem:[#allocation9_spill] sm:$0xff] %v2567_v52  ;;  %3262 = vst [vmem:[#allocation10_spill] sm:$0xff] %v2578_v57  ;;  %v388_v0 = vand.u32 4294901760, %v325_v56  ;;  %v330_v1 = vld [vmem:[%s2572_s27 + $0x28] sm:$0xff]  ;;  %v332_v2 = vld [vmem:[%s2572_s27 + $0x38] sm:$0xff]  ;;  %v392_v4 = vand.u32 4294901760, %v327_v63 }
  0x39   : > { %3263 = vst [vmem:[#allocation11_spill] sm:$0xff] %v2584_v59  ;;  %v394_v5 = vand.u32 4294901760, %v330_v1  ;;  %v398_v6 = vand.u32 4294901760, %v332_v2  ;;  %v329_v7 = vld [vmem:[%s2572_s27 + $0x20] sm:$0xff]  ;;  %v331_v8 = vld [vmem:[%s2572_s27 + $0x30] sm:$0xff]  ;;  %v334_v9 = vld [vmem:[%s2572_s27 + $0x48] sm:$0xff]  ;;  %v2601_v11 = vpack.c.bf16 %v390_v62, %v386_v61  ;;  %v2603_v12 = vsub.f32 %v326_v54, %v386_v61 }
  0x3a   : > { %3264 = vst [vmem:[#allocation12_spill] sm:$0xff] %v2599_v10  ;;  %v2605_v13 = vsub.f32 %v328_v55, %v390_v62  ;;  %v2607_v14 = vsub.f32 %v325_v56, %v388_v0  ;;  %v336_v15 = vld [vmem:[%s2572_s27 + $0x58] sm:$0xff]  ;;  %v333_v16 = vld [vmem:[%s2572_s27 + $0x40] sm:$0xff]  ;;  %v335_v17 = vld [vmem:[%s2572_s27 + $0x50] sm:$0xff]  ;;  %v2612_v18 = vpack.c.bf16 %v392_v4, %v388_v0  ;;  %v2614_v19 = vsub.f32 %v327_v63, %v392_v4 }
  0x3b   : > { %3265 = vst [vmem:[#allocation13_spill] sm:$0xff] %v2601_v11  ;;  %3266 = vst [vmem:[#allocation14_spill] sm:$0xff] %v2603_v12  ;;  %v2616_v20 = vpack.c.bf16 %v398_v6, %v394_v5  ;;  %v2618_v21 = vsub.f32 %v330_v1, %v394_v5  ;;  %v338_v22 = vld [vmem:[%s2572_s27 + $0x68] sm:$0xff]  ;;  %v340_v23 = vld [vmem:[%s2572_s27 + $0x78] sm:$0xff]  ;;  %2038 = vmatprep.subr.bf16.mxu1 %v2601_v11  ;;  %2146 = vmatprep.subr.bf16.mxu0 %v2601_v11  ;;  %v396_v25 = vand.u32 4294901760, %v329_v7  ;;  %vm1780_vm1 = vcmask 64512  }
  0x3c   : > { %3267 = vst [vmem:[#allocation15_spill] sm:$0xff] %v2605_v13  ;;  %3268 = vst [vmem:[#allocation16_spill] sm:$0xff] %v2612_v18  ;;  %v2624_v24 = vsub.f32 %v332_v2, %v398_v6  ;;  %v400_v26 = vand.u32 4294901760, %v331_v8  ;;  %v402_v27 = vand.u32 4294901760, %v334_v9  ;;  %2040 = vmatpush1.bf16.msra.mxu1 %v2612_v18  ;;  %2148 = vmatpush1.bf16.msra.mxu0 %v2612_v18  ;;  %v406_v28 = vand.u32 4294901760, %v336_v15  ;;  %v337_v32 = vld [vmem:[%s2572_s27 + $0x60] sm:$0xff] }
  0x3d   : > { %3269 = vst [vmem:[#allocation17_spill] sm:$0xff] %v2616_v20  ;;  %3270 = vst [vmem:[#allocation18_spill] sm:$0xff] %v2618_v21  ;;  %v404_v29 = vand.u32 4294901760, %v333_v16  ;;  %v408_v30 = vand.u32 4294901760, %v335_v17  ;;  %v410_v31 = vand.u32 4294901760, %v338_v22  ;;  %2042 = vmatprep.subr.bf16.mxu1 %v2616_v20  ;;  %2150 = vmatprep.subr.bf16.mxu0 %v2616_v20  ;;  %v2633_v34 = vsub.f32 %v329_v7, %v396_v25  ;;  %v339_v37 = vld [vmem:[%s2572_s27 + $0x70] sm:$0xff] }
  0x3e   : > { %3271 = vst [vmem:[#allocation19_spill] sm:$0xff] %v2624_v24  ;;  %v2631_v33 = vpack.c.bf16 %v400_v26, %v396_v25  ;;  %v2635_v35 = vsub.f32 %v331_v8, %v400_v26  ;;  %v414_v36 = vand.u32 4294901760, %v340_v23  ;;  %v342_v38 = vld [vmem:[%s2572_s27 + $0x88] sm:$0xff]  ;;  %v344_v39 = vld [vmem:[%s2572_s27 + $0x98] sm:$0xff]  ;;  %v2640_v41 = vpack.c.bf16 %v406_v28, %v402_v27  ;;  %v341_v48 = vld [vmem:[%s2572_s27 + $0x80] sm:$0xff] }
  0x3f   : > { %3273 = vst [vmem:[#allocation21_spill] sm:$0xff] %v2633_v34  ;;  %v2642_v42 = vsub.f32 %v334_v9, %v402_v27  ;;  %v2644_v43 = vsub.f32 %v336_v15, %v406_v28  ;;  %v2646_v47 = vpack.c.bf16 %v408_v30, %v404_v29  ;;  %v343_v49 = vld [vmem:[%s2572_s27 + $0x90] sm:$0xff]  ;;  %v346_v54 = vld [vmem:[%s2572_s27 + $0xa8] sm:$0xff]  ;;  %v2651_v55 = vsub.f32 %v333_v16, %v404_v29  ;;  %v348_v4 = vld [vmem:[%s2572_s27 + $0xb8] sm:$0xff] }
  0x40   : > { %3272 = vst [vmem:[#allocation20_spill] sm:$0xff] %v2631_v33  ;;  %3274 = vst [vmem:[#allocation22_spill] sm:$0xff] %v2635_v35  ;;  %v2653_v56 = vsub.f32 %v335_v17, %v408_v30  ;;  %v2655_v61 = vpack.c.bf16 %v414_v36, %v410_v31  ;;  %v2657_v62 = vsub.f32 %v338_v22, %v410_v31  ;;  %2044 = vmatpush1.bf16.msra.mxu1 %v2631_v33  ;;  %v345_v9 = vld [vmem:[%s2572_s27 + $0xa0] sm:$0xff]  ;;  %v347_v15 = vld [vmem:[%s2572_s27 + $0xb0] sm:$0xff] }
  0x41   : > { %3275 = vst [vmem:[#allocation23_spill] sm:$0xff] %v2640_v41  ;;  %3276 = vst [vmem:[#allocation24_spill] sm:$0xff] %v2642_v42  ;;  %2152 = vmatpush1.bf16.msra.mxu0 %v2631_v33  ;;  %v2661_v63 = vsub.f32 %v340_v23, %v414_v36  ;;  %v412_v0 = vand.u32 4294901760, %v337_v32  ;;  %v416_v1 = vand.u32 4294901760, %v339_v37  ;;  %v418_v2 = vand.u32 4294901760, %v342_v38  ;;  %2046 = vmatprep.subr.bf16.mxu1 %v2640_v41  ;;  %v350_v25 = vld [vmem:[%s2572_s27 + $0xc8] sm:$0xff] }
  0x42   : > { %3277 = vst [vmem:[#allocation25_spill] sm:$0xff] %v2646_v47  ;;  %3278 = vst [vmem:[#allocation26_spill] sm:$0xff] %v2655_v61  ;;  %2154 = vmatprep.subr.bf16.mxu0 %v2640_v41  ;;  %v422_v5 = vand.u32 4294901760, %v344_v39  ;;  %v420_v6 = vand.u32 4294901760, %v341_v48  ;;  %v424_v7 = vand.u32 4294901760, %v343_v49  ;;  %v426_v8 = vand.u32 4294901760, %v346_v54 }
  0x43   : > { %v2668_v16 = vpack.c.bf16 %v416_v1, %v412_v0  ;;  %v2670_v17 = vsub.f32 %v337_v32, %v412_v0  ;;  %v2672_v22 = vsub.f32 %v339_v37, %v416_v1  ;;  %v2674_v23 = vsub.f32 %v342_v38, %v418_v2  ;;  %v352_v26 = vld [vmem:[%s2572_s27 + $0xd8] sm:$0xff]  ;;  %v349_v27 = vld [vmem:[%s2572_s27 + $0xc0] sm:$0xff]  ;;  %v351_v36 = vld [vmem:[%s2572_s27 + $0xd0] sm:$0xff] }
  0x44   : > { %v2679_v28 = vpack.c.bf16 %v422_v5, %v418_v2  ;;  %v2681_v29 = vsub.f32 %v344_v39, %v422_v5  ;;  %v2683_v30 = vpack.c.bf16 %v424_v7, %v420_v6  ;;  %v2685_v31 = vsub.f32 %v341_v48, %v420_v6  ;;  %2048 = vmatpush1.bf16.msra.mxu1 %v2646_v47  ;;  %v354_v5 = vld [vmem:[%s2572_s27 + $0xe8] sm:$0xff]  ;;  %v353_v52 = vld [vmem:[%s2572_s27 + $0xe0] sm:$0xff]  ;;  %v355_v51 = vld [vmem:[%s2572_s27 + $0xf0] sm:$0xff] }
  0x45   : > { %3279 = vst [vmem:[#allocation27_spill] sm:$0xff] %v2668_v16  ;;  %2156 = vmatpush1.bf16.msra.mxu0 %v2646_v47  ;;  %v2690_v32 = vsub.f32 %v343_v49, %v424_v7  ;;  %v430_v37 = vand.u32 4294901760, %v348_v4  ;;  %v2692_v38 = vsub.f32 %v346_v54, %v426_v8  ;;  %v428_v39 = vand.u32 4294901760, %v345_v9  ;;  %2050 = vmatprep.subr.bf16.mxu1 %v2655_v61  ;;  %v356_v47 = vld [vmem:[%s2572_s27 + $0xf8] sm:$0xff]  ;;  %v358_v45 = vld [vmem:[%s2572_s27 + $0x108] sm:$0xff]  ;;  %v357_v20 = vld [vmem:[%s2572_s27 + $0x100] sm:$0xff] }
  0x46   : > { %3280 = vst [vmem:[#allocation28_spill] sm:$0xff] %v2679_v28  ;;  %3281 = vst [vmem:[#allocation29_spill] sm:$0xff] %v2683_v30  ;;  %2158 = vmatprep.subr.bf16.mxu0 %v2655_v61  ;;  %v432_v48 = vand.u32 4294901760, %v347_v15  ;;  %v434_v0 = vand.u32 4294901760, %v350_v25  ;;  %v438_v1 = vand.u32 4294901760, %v352_v26  ;;  %v436_v2 = vand.u32 4294901760, %v349_v27 }
  0x47   : > { %v2697_v49 = vpack.c.bf16 %v430_v37, %v426_v8  ;;  %v2699_v6 = vsub.f32 %v348_v4, %v430_v37  ;;  %v2701_v7 = vsub.f32 %v345_v9, %v428_v39  ;;  %v440_v54 = vand.u32 4294901760, %v351_v36  ;;  %v360_v8 = vld [vmem:[%s2572_s27 + $0x118] sm:$0xff]  ;;  %v359_v18 = vld [vmem:[%s2572_s27 + $0x110] sm:$0xff]  ;;  %s2023_s27 = sshll.u32 %s263_s5, 7  ;;  %s2034_s5 = sshll.u32 %s300_s15, 6 }
  0x48   : > { %v2706_v41 = vpack.c.bf16 %v432_v48, %v428_v39  ;;  %v2708_v61 = vsub.f32 %v347_v15, %v432_v48  ;;  %v2710_v33 = vpack.c.bf16 %v438_v1, %v434_v0  ;;  %v2712_v46 = vsub.f32 %v350_v25, %v434_v0  ;;  %2052 = vmatpush1.bf16.msra.mxu1 %v2668_v16  ;;  %s3114_s28 = scalar_lea.vmem [#allocation3], %s2023_s27  ;;  %s3137_s6 = scalar_lea.vmem %s3201_s3, %s2034_s5 }
  0x49   : > { %3282 = vst [vmem:[#allocation30_spill] sm:$0xff] %v2697_v49  ;;  %2160 = vmatpush1.bf16.msra.mxu0 %v2668_v16  ;;  %v2719_v4 = vsub.f32 %v352_v26, %v438_v1  ;;  %v2721_v9 = vpack.c.bf16 %v440_v54, %v436_v2  ;;  %v2723_v37 = vsub.f32 %v349_v27, %v436_v2  ;;  %v442_v15 = vand.u32 4294901760, %v354_v5  ;;  %s308_s9 = scalar_lea.vmem %s3202_s4, %s2034_s5 }
  0x4a   : > { %3283 = vst [vmem:[#allocation31_spill] sm:$0xff] %v2706_v41  ;;  %3284 = vst [vmem:[#allocation32_spill] sm:$0xff] %v2710_v33  ;;  %2054 = vmatprep.subr.bf16.mxu1 %v2679_v28  ;;  %2162 = vmatprep.subr.bf16.mxu0 %v2679_v28  ;;  %v2727_v25 = vsub.f32 %v351_v36, %v440_v54  ;;  %v446_v39 = vand.u32 4294901760, %v356_v47  ;;  %v444_v48 = vand.u32 4294901760, %v353_v52  ;;  %v448_v0 = vand.u32 4294901760, %v355_v51 }
  0x4b   : > { %3285 = vst [vmem:[#allocation33_spill] sm:$0xff] %v2721_v9  ;;  %v2730_v40 = vsub.f32 %v354_v5, %v442_v15  ;;  %v450_v16 = vand.u32 4294901760, %v358_v45  ;;  %v454_v26 = vand.u32 4294901760, %v360_v8  ;;  %v452_v1 = vand.u32 4294901760, %v357_v20 }
  0x4c   : > { %v2732_v11 = vpack.c.bf16 %v446_v39, %v442_v15  ;;  %v2734_v27 = vsub.f32 %v356_v47, %v446_v39  ;;  %v2736_v2 = vpack.c.bf16 %v448_v0, %v444_v48  ;;  %v2738_v44 = vsub.f32 %v353_v52, %v444_v48  ;;  %2056 = vmatpush1.bf16.msra.mxu1 %v2683_v30 }
  0x4d   : > { %2164 = vmatpush1.bf16.msra.mxu0 %v2683_v30  ;;  %v2742_v36 = vsub.f32 %v355_v51, %v448_v0  ;;  %v2744_v54 = vpack.c.bf16 %v454_v26, %v450_v16  ;;  %v2746_v5 = vsub.f32 %v358_v45, %v450_v16  ;;  %v456_v28 = vand.u32 4294901760, %v359_v18  ;;  %2058 = vmatprep.subr.bf16.mxu1 %v2697_v49 }
  0x4e   : > { %3286 = vst [vmem:[#allocation34_spill] sm:$0xff] %v2732_v11  ;;  %3287 = vst [vmem:[#allocation35_spill] sm:$0xff] %v2736_v2  ;;  %2166 = vmatprep.subr.bf16.mxu0 %v2697_v49  ;;  %v2750_v47 = vsub.f32 %v360_v8, %v454_v26  ;;  %v2752_v15 = vsub.f32 %v357_v20, %v452_v1  ;;  %v488_v52 = vand.u32 4294901760, %v2578_v57  ;;  %v617_v39 = vand.u32 4294901760, %v2603_v12 }
  0x4f   : > { %3288 = vst [vmem:[#allocation36_spill] sm:$0xff] %v2744_v54  ;;  %v2756_v48 = vpack.c.bf16 %v456_v28, %v452_v1  ;;  %v2758_v51 = vsub.f32 %v359_v18, %v456_v28  ;;  %v629_v45 = vand.u32 4294901760, %v2605_v13  ;;  %v3229_v16 = vand.u32 4294901760, %v2563_v50 }
  0x50   : > { %3289 = vst [vmem:[#allocation37_spill] sm:$0xff] %v2752_v15  ;;  %v489_v0 = vsub.f32 %v2578_v57, %v488_v52  ;;  %v618_v49 = vsub.f32 %v2603_v12, %v617_v39  ;;  %1244 = vmatprep.mubr.f32.mxu0 %v488_v52  ;;  %v623_v20 = vand.u32 4294901760, %v2607_v14  ;;  %v635_v8 = vand.u32 4294901760, %v2614_v19  ;;  %2060 = vmatpush1.bf16.msra.mxu1 %v2706_v41 }
  0x51   : > { %3290 = vst [vmem:[#allocation38_spill] sm:$0xff] %v2758_v51  ;;  %2168 = vmatpush1.bf16.msra.mxu0 %v2706_v41  ;;  %v630_v18 = vsub.f32 %v2605_v13, %v629_v45  ;;  %v2769_v28 = vpack.c.bf16 %v629_v45, %v617_v39  ;;  %v2774_v26 = vsub.f32 %v2563_v50, %v3229_v16  ;;  %v641_v1 = vand.u32 4294901760, %v2618_v21 }
  0x52   : > { %2062 = vmatprep.subr.bf16.mxu1 %v2710_v33  ;;  %2170 = vmatprep.subr.bf16.mxu0 %v2710_v33  ;;  %v490_v52 = vand.u32 4294901760, %v489_v0  ;;  %v619_v57 = vand.u32 4294901760, %v618_v49  ;;  %v624_v30 = vsub.f32 %v2607_v14, %v623_v20  ;;  %v636_v41 = vsub.f32 %v2614_v19, %v635_v8 }
  0x53   : > { %v631_v13 = vand.u32 4294901760, %v630_v18  ;;  %v2782_v45 = vpack.c.bf16 %v635_v8, %v623_v20  ;;  %v642_v16 = vsub.f32 %v2618_v21, %v641_v1  ;;  %v653_v15 = vand.u32 4294901760, %v2624_v24 }
  0x54   : > { %491 = vmatprep.mubr.f32.mxu1 %v490_v52  ;;  %v625_v12 = vand.u32 4294901760, %v624_v30  ;;  %v637_v51 = vand.u32 4294901760, %v636_v41  ;;  %v647_v33 = vand.u32 4294901760, %v2633_v34  ;;  %2064 = vmatpush1.bf16.msra.mxu1 %v2721_v9  ;;  %v659_v18 = vand.u32 4294901760, %v2635_v35 }
  0x55   : > { %2172 = vmatpush1.bf16.msra.mxu0 %v2721_v9  ;;  %v2073_v49 = vpack.c.bf16 %v631_v13, %v619_v57  ;;  %v643_v0 = vand.u32 4294901760, %v642_v16  ;;  %v3237_v20 = vand.u32 4294901760, %v2581_v58  ;;  %2066 = vmatprep.subr.bf16.mxu1 %v2732_v11  ;;  %v654_v41 = vsub.f32 %v2624_v24, %v653_v15 }
  0x56   : > { %2174 = vmatprep.subr.bf16.mxu0 %v2732_v11  ;;  %v2075_v30 = vpack.c.bf16 %v637_v51, %v625_v12  ;;  %v2185_v8 = vpack.c.bf16 %v653_v15, %v641_v1  ;;  %v665_v52 = vand.u32 4294901760, %v2642_v42  ;;  %v648_v39 = vsub.f32 %v2633_v34, %v647_v33 }
  0x57   : > { %v660_v9 = vsub.f32 %v2635_v35, %v659_v18  ;;  %v2797_v57 = vpack.c.bf16 %v659_v18, %v647_v33  ;;  %v505_v13 = vsub.f32 %v2581_v58, %v3237_v20  ;;  %v655_v16 = vand.u32 4294901760, %v654_v41 }
  0x58   : > { %v666_v21 = vsub.f32 %v2642_v42, %v665_v52  ;;  %v677_v12 = vand.u32 4294901760, %v2644_v43  ;;  %v510_v51 = vand.u32 4294901760, %v2584_v59  ;;  %2068 = vmatpush1.bf16.msra.mxu1 %v2736_v2  ;;  %v649_v15 = vand.u32 4294901760, %v648_v39 }
  0x59   : > { %2176 = vmatpush1.bf16.msra.mxu0 %v2736_v2  ;;  %v661_v1 = vand.u32 4294901760, %v660_v9  ;;  %v506_v11 = vand.u32 4294901760, %v505_v13  ;;  %v671_v33 = vand.u32 4294901760, %v2651_v55  ;;  %2070 = vmatprep.subr.bf16.mxu1 %v2744_v54  ;;  %v2077_v18 = vpack.c.bf16 %v655_v16, %v643_v0 }
  0x5a   : > { %2178 = vmatprep.subr.bf16.mxu0 %v2744_v54  ;;  %v667_v41 = vand.u32 4294901760, %v666_v21  ;;  %v678_v20 = vsub.f32 %v2644_v43, %v677_v12  ;;  %v2811_v42 = vpack.c.bf16 %v677_v12, %v665_v52  ;;  %v511_v34 = vsub.f32 %v2584_v59, %v510_v51 }
  0x5b   : > { %v2079_v35 = vpack.c.bf16 %v661_v1, %v649_v15  ;;  %v672_v2 = vsub.f32 %v2651_v55, %v671_v33  ;;  %v683_v9 = vand.u32 4294901760, %v2653_v56  ;;  %v3245_v13 = vand.u32 4294901760, %v2593_v3 }
  0x5c   : > { %v679_v39 = vand.u32 4294901760, %v678_v20  ;;  %v689_v24 = vand.u32 4294901760, %v2657_v62  ;;  %v701_v54 = vand.u32 4294901760, %v2661_v63  ;;  %2072 = vmatpush1.bf16.msra.mxu1 %v2756_v48  ;;  %v512_v21 = vand.u32 4294901760, %v511_v34 }
  0x5d   : > { %2180 = vmatpush1.bf16.msra.mxu0 %v2756_v48  ;;  %v673_v0 = vand.u32 4294901760, %v672_v2  ;;  %v684_v52 = vsub.f32 %v2653_v56, %v683_v9  ;;  %v2822_v16 = vpack.c.bf16 %v683_v9, %v671_v33  ;;  %2074 = vmatprep.subr.bf16.mxu1 %v2073_v49  ;;  %v521_v12 = vsub.f32 %v2593_v3, %v3245_v13 }
  0x5e   : > { %2182 = vmatprep.subr.bf16.mxu0 %v2769_v28  ;;  %v2081_v20 = vpack.c.bf16 %v679_v39, %v667_v41  ;;  %v690_v15 = vsub.f32 %v2657_v62, %v689_v24  ;;  %v526_v1 = vand.u32 4294901760, %v2599_v10  ;;  %v702_v34 = vsub.f32 %v2661_v63, %v701_v54 }
  0x5f   : > { %v685_v59 = vand.u32 4294901760, %v684_v52  ;;  %v2831_v2 = vpack.c.bf16 %v701_v54, %v689_v24  ;;  %v695_v33 = vand.u32 4294901760, %v2670_v17  ;;  %v3291_v49 = vand.u32 4294901760, %v2774_v26 }
  0x60   : > { %v3292_v28 = vand.u32 4294901760, %v2563_v50  ;;  %v522_v41 = vand.u32 4294901760, %v521_v12  ;;  %v691_v9 = vand.u32 4294901760, %v690_v15  ;;  %v527_v39 = vsub.f32 %v2599_v10, %v526_v1  ;;  %v315_v12 = vld [vmem:[%s3198_s0 + $0x30] sm:$0xff] }
  0x61   : > { %497 = vmatmul.mubr.f32.vlgmr.msra.gmra.mrb[0].mxu1 %v3291_v49  ;;  %v707_v13 = vand.u32 4294901760, %v2672_v22  ;;  %v2083_v52 = vpack.c.bf16 %v685_v59, %v673_v0  ;;  %v703_v24 = vand.u32 4294901760, %v702_v34  ;;  %v696_v54 = vsub.f32 %v2670_v17, %v695_v33 }
  0x62   : > { %1248 = vmatmul.mubr.f32.vlgmr.msra.gmra.mrb[0].mxu0 %v3292_v28  ;;  %2076 = vmatpush1.bf16.msra.mxu1 %v2075_v30  ;;  %v2844_v26 = vsub.f32 %v2570_v53, %v2587_v60  ;;  %v528_v15 = vand.u32 4294901760, %v527_v39  ;;  %v713_v59 = vand.u32 4294901760, %v2674_v23  ;;  %v725_v28 = vand.u32 4294901760, %v2681_v29 }
  0x63   : > { %2184 = vmatpush1.bf16.msra.mxu0 %v2782_v45  ;;  %2078 = vmatprep.subr.bf16.mxu1 %v2077_v18  ;;  %v708_v49 = vsub.f32 %v2672_v22, %v707_v13  ;;  %v2850_v30 = vpack.c.bf16 %v707_v13, %v695_v33  ;;  %v3294_v45 = vand.u32 4294901760, %v2581_v58  ;;  %v2085_v0 = vpack.c.bf16 %v703_v24, %v691_v9 }
  0x64   : > { %3293 = vst [vmem:[#allocation39_spill] sm:$0xff] %v2844_v26  ;;  %2186 = vmatprep.subr.bf16.mxu0 %v2185_v8  ;;  %507 = vmatprep.mubr.f32.mxu1 %v506_v11  ;;  %v697_v53 = vand.u32 4294901760, %v696_v54  ;;  %v536_v34 = vand.u32 4294901760, %v2844_v26  ;;  %v714_v18 = vsub.f32 %v2674_v23, %v713_v59  ;;  %v2858_v39 = vand.u32 4294901760, %v315_v12 }
  0x65   : > { %1256 = vmatprep.mubr.f32.mxu0 %v3294_v45  ;;  %513 = vmatmul.mubr.f32.gmra.mrb[2].mxu1 %v512_v21  ;;  %v709_v8 = vand.u32 4294901760, %v708_v49  ;;  %v719_v13 = vand.u32 4294901760, %v2685_v31  ;;  %v726_v33 = vsub.f32 %v2681_v29, %v725_v28  ;;  %v2197_v9 = vpack.c.bf16 %v725_v28, %v713_v59 }
  0x66   : > { %1260 = vmatmul.mubr.f32.gmra.mrb[2].mxu0 %v510_v51  ;;  %2080 = vmatpush1.bf16.msra.mxu1 %v2079_v35  ;;  %v537_v11 = vsub.f32 %v2844_v26, %v536_v34  ;;  %v731_v24 = vand.u32 4294901760, %v2690_v32  ;;  %v318_v51 = vld [vmem:[%s3198_s0 + $0x48] sm:$0xff]  ;;  %v715_v54 = vand.u32 4294901760, %v714_v18  ;;  %v2870_v35 = vsub.f32 %v315_v12, %v2858_v39 }
  0x67   : > { %2188 = vmatpush1.bf16.msra.mxu0 %v2797_v57  ;;  %2082 = vmatprep.subr.bf16.mxu1 %v2081_v20  ;;  %v2087_v21 = vpack.c.bf16 %v709_v8, %v697_v53  ;;  %v720_v57 = vsub.f32 %v2685_v31, %v719_v13  ;;  %v3296_v49 = vand.u32 4294901760, %v2593_v3  ;;  %v727_v45 = vand.u32 4294901760, %v726_v33 }
  0x68   : > { %2190 = vmatprep.subr.bf16.mxu0 %v2811_v42  ;;  %3295 = vst [vmem:[#allocation40_spill] sm:$0xff] %v2870_v35  ;;  %523 = vmatprep.mubr.f32.mxu1 %v522_v41  ;;  %v538_v59 = vand.u32 4294901760, %v537_v11  ;;  %v732_v28 = vsub.f32 %v2690_v32, %v731_v24  ;;  %v2199_v26 = vpack.c.bf16 %v731_v24, %v719_v13  ;;  %v317_v42 = vld [vmem:[%s3198_s0 + $0x40] sm:$0xff]  ;;  %v542_v20 = vand.u32 4294901760, %v2870_v35 }
  0x69   : > { %1268 = vmatprep.mubr.f32.mxu0 %v3296_v49  ;;  %529 = vmatmul.mubr.f32.gmra.mrb[4].mxu1 %v528_v15  ;;  %v721_v12 = vand.u32 4294901760, %v720_v57  ;;  %v375_v53 = vsel %vm361_vm0, %v318_v51, 0  ;;  %v737_v41 = vand.u32 4294901760, %v2692_v38  ;;  %v2089_v8 = vpack.c.bf16 %v727_v45, %v715_v54 }
  0x6a   : > { %1272 = vmatmul.mubr.f32.gmra.mrb[4].mxu0 %v526_v1  ;;  %2084 = vmatpush1.bf16.msra.mxu1 %v2083_v52  ;;  %v733_v18 = vand.u32 4294901760, %v732_v28  ;;  %v2883_v11 = vand.u32 4294901760, %v375_v53  ;;  %v749_v13 = vand.u32 4294901760, %v2699_v6  ;;  %v543_v1 = vsub.f32 %v2870_v35, %v542_v20 }
  0x6b   : > { %2192 = vmatpush1.bf16.msra.mxu0 %v2822_v16  ;;  %2086 = vmatprep.subr.bf16.mxu1 %v2085_v0  ;;  %v738_v15 = vsub.f32 %v2692_v38, %v737_v41  ;;  %v2889_v33 = vand.u32 4294901760, %v317_v42  ;;  %v743_v24 = vand.u32 4294901760, %v2701_v7  ;;  %v755_v0 = vand.u32 4294901760, %v2708_v61 }
  0x6c   : > { %2194 = vmatprep.subr.bf16.mxu0 %v2831_v2  ;;  %539 = vmatprep.mubr.f32.mxu1 %v538_v59  ;;  %v2091_v16 = vpack.c.bf16 %v733_v18, %v721_v12  ;;  %v2893_v52 = vsub.f32 %v375_v53, %v2883_v11  ;;  %v750_v51 = vsub.f32 %v2699_v6, %v749_v13  ;;  %v320_v2 = vld [vmem:[%s3198_s0 + $0x58] sm:$0xff]  ;;  %v544_v54 = vand.u32 4294901760, %v543_v1 }
  0x6d   : > { %1280 = vmatprep.mubr.f32.mxu0 %v536_v34  ;;  %v739_v57 = vand.u32 4294901760, %v738_v15  ;;  %v2201_v49 = vpack.c.bf16 %v749_v13, %v737_v41  ;;  %v2901_v45 = vsub.f32 %v317_v42, %v2889_v33  ;;  %v744_v28 = vsub.f32 %v2701_v7, %v743_v24 }
  0x6e   : > { %3297 = vst [vmem:[#allocation41_spill] sm:$0xff] %v2893_v52  ;;  %1284 = vmatmul.mubr.f32.gmra.mrb[6].mxu0 %v542_v20  ;;  %2088 = vmatpush1.bf16.msra.mxu1 %v2087_v21  ;;  %v552_v34 = vand.u32 4294901760, %v2893_v52  ;;  %v751_v59 = vand.u32 4294901760, %v750_v51  ;;  %v756_v12 = vsub.f32 %v2708_v61, %v755_v0  ;;  %v2203_v20 = vpack.c.bf16 %v755_v0, %v743_v24 }
  0x6f   : > { %3298 = vst [vmem:[#allocation42_spill] sm:$0xff] %v2901_v45  ;;  %2196 = vmatpush1.bf16.msra.mxu0 %v2850_v30  ;;  %2090 = vmatprep.subr.bf16.mxu1 %v2089_v8  ;;  %v558_v53 = vand.u32 4294901760, %v2901_v45  ;;  %v378_v41 = vsel %vm361_vm0, %v320_v2, 0  ;;  %v761_v42 = vand.u32 4294901760, %v2712_v46  ;;  %v319_v30 = vld [vmem:[%s3198_s0 + $0x50] sm:$0xff]  ;;  %v745_v13 = vand.u32 4294901760, %v744_v28 }
  0x70   : > { %2198 = vmatprep.subr.bf16.mxu0 %v2197_v9  ;;  %545 = vmatmul.mubr.f32.gmra.mrb[6].mxu1 %v544_v54  ;;  %v553_v21 = vsub.f32 %v2893_v52, %v552_v34  ;;  %v2093_v18 = vpack.c.bf16 %v751_v59, %v739_v57  ;;  %v757_v1 = vand.u32 4294901760, %v756_v12  ;;  %v2915_v8 = vand.u32 4294901760, %v378_v41  ;;  %v322_v57 = vld [vmem:[%s3198_s0 + $0x68] sm:$0xff] }
  0x71   : > { %1292 = vmatprep.mubr.f32.mxu0 %v552_v34  ;;  %v559_v9 = vsub.f32 %v2901_v45, %v558_v53  ;;  %v762_v15 = vsub.f32 %v2712_v46, %v761_v42  ;;  %v773_v24 = vand.u32 4294901760, %v2719_v4  ;;  %v2919_v2 = vand.u32 4294901760, %v319_v30 }
  0x72   : > { %1296 = vmatmul.mubr.f32.gmra.mrb[8].mxu0 %v558_v53  ;;  %2092 = vmatpush1.bf16.msra.mxu1 %v2091_v16  ;;  %v554_v51 = vand.u32 4294901760, %v553_v21  ;;  %v2095_v0 = vpack.c.bf16 %v757_v1, %v745_v13  ;;  %v767_v54 = vand.u32 4294901760, %v2723_v37  ;;  %v2926_v59 = vsub.f32 %v378_v41, %v2915_v8  ;;  %v321_v1 = vld [vmem:[%s3198_s0 + $0x60] sm:$0xff] }
  0x73   : > { %2200 = vmatpush1.bf16.msra.mxu0 %v2199_v26  ;;  %2094 = vmatprep.subr.bf16.mxu1 %v2093_v18  ;;  %v560_v34 = vand.u32 4294901760, %v559_v9  ;;  %v763_v28 = vand.u32 4294901760, %v762_v15  ;;  %v774_v16 = vsub.f32 %v2719_v4, %v773_v24  ;;  %v2205_v26 = vpack.c.bf16 %v773_v24, %v761_v42 }
  0x74   : > { %2202 = vmatprep.subr.bf16.mxu0 %v2201_v49  ;;  %3299 = vst [vmem:[#allocation43_spill] sm:$0xff] %v2926_v59  ;;  %555 = vmatprep.mubr.f32.mxu1 %v554_v51  ;;  %v2930_v12 = vsub.f32 %v319_v30, %v2919_v2  ;;  %v768_v53 = vsub.f32 %v2723_v37, %v767_v54  ;;  %v779_v21 = vand.u32 4294901760, %v2727_v25  ;;  %v568_v18 = vand.u32 4294901760, %v2926_v59 }
  0x75   : > { %561 = vmatmul.mubr.f32.gmra.mrb[8].mxu1 %v560_v34  ;;  %v775_v49 = vand.u32 4294901760, %v774_v16  ;;  %v381_v13 = vsel %vm361_vm0, %v322_v57, 0  ;;  %v785_v41 = vand.u32 4294901760, %v2730_v40 }
  0x76   : > { %3300 = vst [vmem:[#allocation44_spill] sm:$0xff] %v2930_v12  ;;  %2096 = vmatpush1.bf16.msra.mxu1 %v2095_v0  ;;  %v574_v42 = vand.u32 4294901760, %v2930_v12  ;;  %v769_v30 = vand.u32 4294901760, %v768_v53  ;;  %v780_v9 = vsub.f32 %v2727_v25, %v779_v21  ;;  %v2207_v15 = vpack.c.bf16 %v779_v21, %v767_v54  ;;  %1304 = vmatprep.mubr.f32.mxu0 %v568_v18  ;;  %v324_v21 = vld [vmem:[%s3198_s0 + $0x78] sm:$0xff] }
  0x77   : > { %2204 = vmatpush1.bf16.msra.mxu0 %v2203_v20  ;;  %v569_v24 = vsub.f32 %v2926_v59, %v568_v18  ;;  %v2097_v51 = vpack.c.bf16 %v775_v49, %v763_v28  ;;  %v2943_v57 = vand.u32 4294901760, %v381_v13  ;;  %v786_v34 = vsub.f32 %v2730_v40, %v785_v41 }
  0x78   : > { %2206 = vmatprep.subr.bf16.mxu0 %v2205_v26  ;;  %v575_v16 = vsub.f32 %v2930_v12, %v574_v42  ;;  %v781_v45 = vand.u32 4294901760, %v780_v9  ;;  %1308 = vmatmul.mubr.f32.gmra.mrb[10].mxu0 %v574_v42  ;;  %v797_v20 = vand.u32 4294901760, %v2734_v27  ;;  %v2948_v0 = vand.u32 4294901760, %v321_v1 }
  0x79   : > { %v570_v53 = vand.u32 4294901760, %v569_v24  ;;  %2098 = vmatprep.subr.bf16.mxu1 %v2097_v51  ;;  %v2951_v54 = vsub.f32 %v381_v13, %v2943_v57  ;;  %v787_v28 = vand.u32 4294901760, %v786_v34  ;;  %v791_v26 = vand.u32 4294901760, %v2738_v44 }
  0x7a   : > { %v576_v18 = vand.u32 4294901760, %v575_v16  ;;  %v2099_v49 = vpack.c.bf16 %v781_v45, %v769_v30  ;;  %v798_v42 = vsub.f32 %v2734_v27, %v797_v20  ;;  %v2209_v9 = vpack.c.bf16 %v797_v20, %v785_v41 }
  0x7b   : > { %3301 = vst [vmem:[#allocation45_spill] sm:$0xff] %v2951_v54  ;;  %2208 = vmatpush1.bf16.msra.mxu0 %v2207_v15  ;;  %571 = vmatprep.mubr.f32.mxu1 %v570_v53  ;;  %v584_v24 = vand.u32 4294901760, %v2951_v54  ;;  %v2960_v51 = vsub.f32 %v321_v1, %v2948_v0  ;;  %v792_v13 = vsub.f32 %v2738_v44, %v791_v26  ;;  %v803_v34 = vand.u32 4294901760, %v2742_v36  ;;  %v323_v53 = vld [vmem:[%s3198_s0 + $0x70] sm:$0xff] }
  0x7c   : > { %577 = vmatmul.mubr.f32.gmra.mrb[10].mxu1 %v576_v18  ;;  %v799_v12 = vand.u32 4294901760, %v798_v42  ;;  %2210 = vmatprep.subr.bf16.mxu0 %v2209_v9  ;;  %v384_v16 = vsel %vm361_vm0, %v324_v21, 0  ;;  %v809_v45 = vand.u32 4294901760, %v2746_v5  ;;  %v821_v30 = vand.u32 4294901760, %v2750_v47 }
  0x7d   : > { %2100 = vmatpush1.bf16.msra.mxu1 %v2099_v49  ;;  %v585_v41 = vsub.f32 %v2951_v54, %v584_v24  ;;  %1316 = vmatprep.mubr.f32.mxu0 %v584_v24  ;;  %v590_v1 = vand.u32 4294901760, %v2960_v51  ;;  %v793_v15 = vand.u32 4294901760, %v792_v13  ;;  %v804_v20 = vsub.f32 %v2742_v36, %v803_v34 }
  0x7e   : > { %v2101_v18 = vpack.c.bf16 %v799_v12, %v787_v28  ;;  %v2211_v42 = vpack.c.bf16 %v803_v34, %v791_v26  ;;  %v2973_v21 = vand.u32 4294901760, %v384_v16  ;;  %v810_v9 = vsub.f32 %v2746_v5, %v809_v45 }
  0x7f   : > { %v586_v59 = vand.u32 4294901760, %v585_v41  ;;  %v591_v49 = vsub.f32 %v2960_v51, %v590_v1  ;;  %v805_v54 = vand.u32 4294901760, %v804_v20  ;;  %1320 = vmatmul.mubr.f32.gmra.mrb[12].mxu0 %v590_v1  ;;  %v822_v24 = vsub.f32 %v2750_v47, %v821_v30  ;;  %v3303_v41 = vld [vmem:[#allocation37_spill] sm:$0xff] }
  0x80   : > { %2102 = vmatprep.subr.bf16.mxu1 %v2101_v18  ;;  %2212 = vmatpush1.bf16.msra.mxu0 %v2211_v42  ;;  %v2979_v13 = vsub.f32 %v384_v16, %v2973_v21  ;;  %v811_v52 = vand.u32 4294901760, %v810_v9  ;;  %v2213_v35 = vpack.c.bf16 %v821_v30, %v809_v45  ;;  %v2981_v12 = vand.u32 4294901760, %v323_v53  ;;  %v3304_v18 = vld [vmem:[#allocation38_spill] sm:$0xff] }
  0x81   : > { %587 = vmatprep.mubr.f32.mxu1 %v586_v59  ;;  %v592_v28 = vand.u32 4294901760, %v591_v49  ;;  %v2103_v26 = vpack.c.bf16 %v805_v54, %v793_v15  ;;  %v823_v34 = vand.u32 4294901760, %v822_v24  ;;  %v815_v10 = vand.u32 4294901760, %v3303_v41 }
  0x82   : > { %3302 = vst [vmem:[#allocation46_spill] sm:$0xff] %v2979_v13  ;;  %v600_v20 = vand.u32 4294901760, %v2979_v13  ;;  %2214 = vmatprep.subr.bf16.mxu0 %v2213_v35  ;;  %v2986_v1 = vsub.f32 %v323_v53, %v2981_v12  ;;  %v827_v42 = vand.u32 4294901760, %v3304_v18 }
  0x83   : > { %593 = vmatmul.mubr.f32.gmra.mrb[12].mxu1 %v592_v28  ;;  %v2105_v16 = vpack.c.bf16 %v823_v34, %v811_v52  ;;  %v816_v45 = vsub.f32 %v3303_v41, %v815_v10  ;;  %v3305_v52 = vld [vmem:[#allocation5_spill] sm:$0xff]  ;;  %v3307_v34 = vld [vmem:[#allocation15_spill] sm:$0xff] }
  0x84   : > { %2104 = vmatpush1.bf16.msra.mxu1 %v2103_v26  ;;  %v601_v59 = vsub.f32 %v2979_v13, %v600_v20  ;;  %1328 = vmatprep.mubr.f32.mxu0 %v600_v20  ;;  %v606_v54 = vand.u32 4294901760, %v2986_v1  ;;  %v828_v30 = vsub.f32 %v3304_v18, %v827_v42  ;;  %v2215_v15 = vpack.c.bf16 %v827_v42, %v815_v10  ;;  %v3306_v26 = vld [vmem:[#allocation14_spill] sm:$0xff]  ;;  %v3308_v13 = vld [vmem:[#allocation13_spill] sm:$0xff]  ;;  %v3309_v10 = vld [vmem:[#allocation4_spill] sm:$0xff] }
  0x85   : > { %2106 = vmatprep.subr.bf16.mxu1 %v2105_v16  ;;  %v817_v35 = vand.u32 4294901760, %v816_v45  ;;  %v2109_v20 = vpack.c.bf16 %v3307_v34, %v3306_v26  ;;  %v2111_v42 = vpack.c.bf16 %v2614_v19, %v2607_v14  ;;  %v3310_v16 = vld [vmem:[#allocation16_spill] sm:$0xff]  ;;  %v3311_v45 = vld [vmem:[#allocation18_spill] sm:$0xff]  ;;  %v3322_v26 = vld [vmem:[#allocation9_spill] sm:$0xff]  ;;  %v2119_v34 = vpack.c.bf16 %v2653_v56, %v2651_v55 }
  0x86   : > { %v602_v9 = vand.u32 4294901760, %v601_v59  ;;  %v607_v53 = vsub.f32 %v2986_v1, %v606_v54  ;;  %v829_v49 = vand.u32 4294901760, %v828_v30  ;;  %1332 = vmatmul.mubr.f32.gmra.mrb[14].mxu0 %v606_v54  ;;  %v3312_v59 = vld [vmem:[#allocation19_spill] sm:$0xff]  ;;  %v3313_v30 = vld [vmem:[#allocation17_spill] sm:$0xff]  ;;  %v3318_v14 = vld [vmem:[#allocation20_spill] sm:$0xff]  ;;  %v2123_v55 = vpack.c.bf16 %v2672_v22, %v2670_v17 }
  0x87   : > { %2216 = vmatpush1.bf16.msra.mxu0 %v2215_v15  ;;  %1511 = vmatprep.mubr.f32.mxu0 %v3305_v52  ;;  %v2113_v54 = vpack.c.bf16 %v3312_v59, %v3311_v45  ;;  %v3314_v15 = vld [vmem:[#allocation6_spill] sm:$0xff]  ;;  %v3319_v19 = vld [vmem:[#allocation24_spill] sm:$0xff]  ;;  %v3325_v56 = vld [vmem:[#allocation27_spill] sm:$0xff]  ;;  %v2127_v17 = vpack.c.bf16 %v2690_v32, %v2685_v31  ;;  %v2131_v31 = vpack.c.bf16 %v2708_v61, %v2701_v7 }
  0x88   : > { %603 = vmatprep.mubr.f32.mxu1 %v602_v9  ;;  %v608_v24 = vand.u32 4294901760, %v607_v53  ;;  %v2107_v28 = vpack.c.bf16 %v829_v49, %v817_v35  ;;  %2218 = vmatprep.subr.bf16.mxu0 %v3308_v13  ;;  %v3315_v13 = vld [vmem:[#allocation7_spill] sm:$0xff]  ;;  %v3316_v35 = vld [vmem:[#allocation21_spill] sm:$0xff]  ;;  %v3317_v9 = vld [vmem:[#allocation22_spill] sm:$0xff]  ;;  %v2117_v49 = vpack.c.bf16 %v2644_v43, %v3319_v19  ;;  %v2121_v43 = vpack.c.bf16 %v2661_v63, %v2657_v62 }
  0x89   : > { %v2115_v53 = vpack.c.bf16 %v3317_v9, %v3316_v35  ;;  %v2125_v62 = vpack.c.bf16 %v2681_v29, %v2674_v23  ;;  %v3326_v63 = vld [vmem:[#allocation28_spill] sm:$0xff]  ;;  %v3327_v22 = vld [vmem:[#allocation29_spill] sm:$0xff]  ;;  %v2129_v23 = vpack.c.bf16 %v2699_v6, %v2692_v38  ;;  %v3328_v29 = vld [vmem:[#allocation30_spill] sm:$0xff]  ;;  %v2133_v38 = vpack.c.bf16 %v2719_v4, %v2712_v46 }
  0x8a   : > { %609 = vmatmul.mubr.f32.gmra.mrb[14].mxu1 %v608_v24  ;;  %1513 = vmatmul.mubr.f32.vlgmr.msra.gmra.mrb[0].mxu0 %v3309_v10  ;;  %v3320_v24 = vld [vmem:[#allocation23_spill] sm:$0xff]  ;;  %v3330_v6 = vld [vmem:[#allocation32_spill] sm:$0xff]  ;;  %v2135_v61 = vpack.c.bf16 %v2727_v25, %v2723_v37  ;;  %v3331_v7 = vld [vmem:[#allocation33_spill] sm:$0xff]  ;;  %v2137_v46 = vpack.c.bf16 %v2734_v27, %v2730_v40  ;;  %v2139_v37 = vpack.c.bf16 %v2742_v36, %v2738_v44 }
  0x8b   : > { %2108 = vmatpush1.bf16.msra.mxu1 %v2107_v28  ;;  %860 = vmatprep.mubr.f32.mxu1 %v3305_v52  ;;  %v3321_v28 = vld [vmem:[#allocation8_spill] sm:$0xff]  ;;  %v3329_v32 = vld [vmem:[#allocation31_spill] sm:$0xff]  ;;  %v3332_v4 = vld [vmem:[#allocation34_spill] sm:$0xff]  ;;  %v2141_v40 = vpack.c.bf16 %v2750_v47, %v2746_v5 }
  0x8c   : > { %2110 = vmatprep.subr.bf16.mxu1 %v2109_v20  ;;  %2220 = vmatpush1.bf16.msra.mxu0 %v3310_v16  ;;  %v3323_v20 = vld [vmem:[#allocation25_spill] sm:$0xff]  ;;  %v3333_v25 = vld [vmem:[#allocation35_spill] sm:$0xff]  ;;  %v3334_v27 = vld [vmem:[#allocation36_spill] sm:$0xff]  ;;  %v2143_v16 = vpack.c.bf16 %v3304_v18, %v3303_v41 }
  0x8d   : > { %2222 = vmatprep.subr.bf16.mxu0 %v3313_v30  ;;  %1519 = vmatprep.mubr.f32.mxu0 %v3314_v15  ;;  %v3335_v45 = vld [vmem:[#allocation10_spill] sm:$0xff]  ;;  %v3336_v44 = vld [vmem:[#allocation11_spill] sm:$0xff]  ;;  %v3337_v36 = vld [vmem:[#allocation12_spill] sm:$0xff] }
  0x8e   : > { %862 = vmatmul.mubr.f32.vlgmr.msra.gmra.mrb[0].mxu1 %v3309_v10  ;;  %1521 = vmatmul.mubr.f32.gmra.mrb[2].mxu0 %v3315_v13  ;;  %v3338_v5 = vld [vmem:[#allocation39_spill] sm:$0xff]  ;;  %v3343_v47 = vld [vmem:[#allocation44_spill] sm:$0xff] }
  0x8f   : > { %2112 = vmatpush1.bf16.msra.mxu1 %v2111_v42  ;;  %868 = vmatprep.mubr.f32.mxu1 %v3314_v15  ;;  %v3324_v42 = vld [vmem:[#allocation26_spill] sm:$0xff] }
  0x90   : > { %2114 = vmatprep.subr.bf16.mxu1 %v2113_v54  ;;  %2224 = vmatpush1.bf16.msra.mxu0 %v3318_v14 }
  0x91   : > { %2226 = vmatprep.subr.bf16.mxu0 %v3320_v24  ;;  %1527 = vmatprep.mubr.f32.mxu0 %v3321_v28 }
  0x92   : > { %870 = vmatmul.mubr.f32.gmra.mrb[2].mxu1 %v3315_v13  ;;  %1529 = vmatmul.mubr.f32.gmra.mrb[4].mxu0 %v3322_v26 }
  0x93   : > { %2116 = vmatpush1.bf16.msra.mxu1 %v2115_v53  ;;  %876 = vmatprep.mubr.f32.mxu1 %v3321_v28 }
  0x94   : > { %2118 = vmatprep.subr.bf16.mxu1 %v2117_v49  ;;  %2228 = vmatpush1.bf16.msra.mxu0 %v3323_v20 }
  0x95   : > { %2230 = vmatprep.subr.bf16.mxu0 %v3324_v42  ;;  %1535 = vmatprep.mubr.f32.mxu0 %v2587_v60 }
  0x96   : > { %878 = vmatmul.mubr.f32.gmra.mrb[4].mxu1 %v3322_v26  ;;  %1537 = vmatmul.mubr.f32.gmra.mrb[6].mxu0 %v2858_v39 }
  0x97   : > { %2120 = vmatpush1.bf16.msra.mxu1 %v2119_v34  ;;  %884 = vmatprep.mubr.f32.mxu1 %v2587_v60 }
  0x98   : > { %2122 = vmatprep.subr.bf16.mxu1 %v2121_v43  ;;  %2232 = vmatpush1.bf16.msra.mxu0 %v3325_v56 }
  0x99   : > { %2234 = vmatprep.subr.bf16.mxu0 %v3326_v63  ;;  %1543 = vmatprep.mubr.f32.mxu0 %v2883_v11 }
  0x9a   : > { %886 = vmatmul.mubr.f32.gmra.mrb[6].mxu1 %v2858_v39  ;;  %1545 = vmatmul.mubr.f32.gmra.mrb[8].mxu0 %v2889_v33 }
  0x9b   : > { %2124 = vmatpush1.bf16.msra.mxu1 %v2123_v55  ;;  %892 = vmatprep.mubr.f32.mxu1 %v2883_v11 }
  0x9c   : > { %2126 = vmatprep.subr.bf16.mxu1 %v2125_v62  ;;  %2236 = vmatpush1.bf16.msra.mxu0 %v3327_v22 }
  0x9d   : > { %2238 = vmatprep.subr.bf16.mxu0 %v3328_v29  ;;  %1551 = vmatprep.mubr.f32.mxu0 %v2915_v8 }
  0x9e   : > { %894 = vmatmul.mubr.f32.gmra.mrb[8].mxu1 %v2889_v33  ;;  %1553 = vmatmul.mubr.f32.gmra.mrb[10].mxu0 %v2919_v2 }
  0x9f   : > { %2128 = vmatpush1.bf16.msra.mxu1 %v2127_v17  ;;  %900 = vmatprep.mubr.f32.mxu1 %v2915_v8 }
  0xa0   : > { %2130 = vmatprep.subr.bf16.mxu1 %v2129_v23  ;;  %2240 = vmatpush1.bf16.msra.mxu0 %v3329_v32 }
  0xa1   : > { %2242 = vmatprep.subr.bf16.mxu0 %v3330_v6  ;;  %1559 = vmatprep.mubr.f32.mxu0 %v2943_v57 }
  0xa2   : > { %902 = vmatmul.mubr.f32.gmra.mrb[10].mxu1 %v2919_v2  ;;  %1561 = vmatmul.mubr.f32.gmra.mrb[12].mxu0 %v2948_v0 }
  0xa3   : > { %2132 = vmatpush1.bf16.msra.mxu1 %v2131_v31  ;;  %908 = vmatprep.mubr.f32.mxu1 %v2943_v57 }
  0xa4   : > { %2134 = vmatprep.subr.bf16.mxu1 %v2133_v38  ;;  %2244 = vmatpush1.bf16.msra.mxu0 %v3331_v7 }
  0xa5   : > { %2246 = vmatprep.subr.bf16.mxu0 %v3332_v4  ;;  %1567 = vmatprep.mubr.f32.mxu0 %v2973_v21 }
  0xa6   : > { %910 = vmatmul.mubr.f32.gmra.mrb[12].mxu1 %v2948_v0  ;;  %1569 = vmatmul.mubr.f32.gmra.mrb[14].mxu0 %v2981_v12 }
  0xa7   : > { %2136 = vmatpush1.bf16.msra.mxu1 %v2135_v61  ;;  %916 = vmatprep.mubr.f32.mxu1 %v2973_v21 }
  0xa8   : > { %2138 = vmatprep.subr.bf16.mxu1 %v2137_v46  ;;  %2248 = vmatpush1.bf16.msra.mxu0 %v3333_v25 }
  0xa9   : > { %2250 = vmatprep.subr.bf16.mxu0 %v3334_v27  ;;  %1676 = vmatprep.mubr.f32.mxu0 %v3305_v52 }
  0xaa   : > { %918 = vmatmul.mubr.f32.gmra.mrb[14].mxu1 %v2981_v12 }
  0xab   : > { %2140 = vmatpush1.bf16.msra.mxu1 %v2139_v37  ;;  %1062 = vmatprep.mubr.f32.mxu1 %v3335_v45 }
  0xac   : > { %2142 = vmatprep.subr.bf16.mxu1 %v2141_v40  ;;  %2252 = vmatpush1.bf16.msra.mxu0 %v2756_v48  ;;  %v3344_v48 = vld [vmem:[#allocation45_spill] sm:$0xff] }
  0xaf   : > { %2144 = vmatpush1.bf16.msra.mxu1 %v2143_v16  ;;  %1678 = vmatmul.mubr.f32.vlgmr.msra.gmra.mrb[0].mxu0 %v3309_v10 }
  0xb0   : > { %1684 = vmatprep.mubr.f32.mxu0 %v3314_v15 }
  0xb2   : > { %1065 = vmatmul.mubr.f32.vlgmr.msra.gmra.mrb[0].mxu1 %v2563_v50  ;;  %v3339_v50 = vld [vmem:[#allocation40_spill] sm:$0xff] }
  0xb3   : > { %1072 = vmatprep.mubr.f32.mxu1 %v2581_v58  ;;  %1686 = vmatmul.mubr.f32.gmra.mrb[2].mxu0 %v3315_v13  ;;  %v3340_v58 = vld [vmem:[#allocation41_spill] sm:$0xff] }
  0xb4   : > { %1692 = vmatprep.mubr.f32.mxu0 %v3321_v28 }
  0xb6   : > { %1075 = vmatmul.mubr.f32.gmra.mrb[2].mxu1 %v3336_v44 }
  0xb7   : > { %1082 = vmatprep.mubr.f32.mxu1 %v2593_v3  ;;  %1694 = vmatmul.mubr.f32.gmra.mrb[4].mxu0 %v3322_v26  ;;  %v3341_v3 = vld [vmem:[#allocation42_spill] sm:$0xff] }
  0xb8   : > { %1700 = vmatprep.mubr.f32.mxu0 %v2587_v60  ;;  %v3342_v60 = vld [vmem:[#allocation43_spill] sm:$0xff] }
  0xba   : > { %1085 = vmatmul.mubr.f32.gmra.mrb[4].mxu1 %v3337_v36 }
  0xbb   : > { %1092 = vmatprep.mubr.f32.mxu1 %v3338_v5  ;;  %1702 = vmatmul.mubr.f32.gmra.mrb[6].mxu0 %v2858_v39  ;;  %v3345_v39 = vld [vmem:[#allocation46_spill] sm:$0xff] }
  0xbc   : > { %1708 = vmatprep.mubr.f32.mxu0 %v2883_v11 }
  0xbe   : > { %1095 = vmatmul.mubr.f32.gmra.mrb[6].mxu1 %v3339_v50 }
  0xbf   : > { %1102 = vmatprep.mubr.f32.mxu1 %v3340_v58  ;;  %1710 = vmatmul.mubr.f32.gmra.mrb[8].mxu0 %v2889_v33 }
  0xc0   : > { %1716 = vmatprep.mubr.f32.mxu0 %v2915_v8 }
  0xc2   : > { %1105 = vmatmul.mubr.f32.gmra.mrb[8].mxu1 %v3341_v3 }
  0xc3   : > { %1112 = vmatprep.mubr.f32.mxu1 %v3342_v60  ;;  %1718 = vmatmul.mubr.f32.gmra.mrb[10].mxu0 %v2919_v2 }
  0xc4   : > { %1724 = vmatprep.mubr.f32.mxu0 %v2943_v57 }
  0xc6   : > { %1115 = vmatmul.mubr.f32.gmra.mrb[10].mxu1 %v3343_v47 }
  0xc7   : > { %1122 = vmatprep.mubr.f32.mxu1 %v3344_v48  ;;  %1726 = vmatmul.mubr.f32.gmra.mrb[12].mxu0 %v2948_v0 }
  0xc8   : > { %1732 = vmatprep.mubr.f32.mxu0 %v2973_v21 }
  0xca   : > { %1125 = vmatmul.mubr.f32.gmra.mrb[12].mxu1 %v2960_v51 }
  0xcb   : > { %1132 = vmatprep.mubr.f32.mxu1 %v3345_v39  ;;  %1734 = vmatmul.mubr.f32.gmra.mrb[14].mxu0 %v2981_v12 }
  0xce   : > { %1135 = vmatmul.mubr.f32.gmra.mrb[14].mxu1 %v2986_v1 }
 0x182   : > { %v1679_v11 = vpop.f32.mrb[0].mxu0 }
 0x183   : > { %v1681_v33 = vpop.f32.mrb[1].mxu0 }
 0x185   : > { %v1066_v8 = vpop.f32.mrb[0].mxu1 }
 0x186   : > { %v2253_v2 = vadd.f32 %v1679_v11, %v1066_v8  ;;  %v1068_v57 = vpop.f32.mrb[1].mxu1  ;;  %v1687_v41 = vpop.f32.mrb[2].mxu0 }
 0x187   : > { %v2254_v18 = vadd.f32 %v1681_v33, %v1068_v57  ;;  %v1689_v0 = vpop.f32.mrb[3].mxu0 }
 0x188   : > { %1740 = vst [vmem:[%s3114_s28] sm:$0xff] %v2253_v2  ;;  %v1789_v51 = vmul.f32 %v2253_v2, %v2253_v2 }
 0x189   : > { %1741 = vst [vmem:[%s3114_s28 + $0x8] sm:$0xff] %v2254_v18  ;;  %v1076_v21 = vpop.f32.mrb[2].mxu1  ;;  %v1756_v12 = vadd.f32 %v2254_v18, %v2253_v2  ;;  %v1790_v1 = vmul.f32 %v2254_v18, %v2254_v18 }
 0x18a   : > { %v2255_v52 = vadd.f32 %v1687_v41, %v1076_v21  ;;  %v1078_v10 = vpop.f32.mrb[3].mxu1  ;;  %v1695_v59 = vpop.f32.mrb[4].mxu0 }
 0x18b   : > { %v2256_v54 = vadd.f32 %v1689_v0, %v1078_v10  ;;  %1757 = vadd.xlane.f32.xlu0 %v1756_v12  ;;  %v1697_v30 = vpop.f32.mrb[5].mxu0  ;;  %v1805_v15 = vadd.f32 %v1790_v1, %v1789_v51 }
 0x18c   : > { %1742 = vst [vmem:[%s3114_s28 + $0x10] sm:$0xff] %v2255_v52  ;;  %v1791_v13 = vmul.f32 %v2255_v52, %v2255_v52 }
 0x18d   : > { %1743 = vst [vmem:[%s3114_s28 + $0x18] sm:$0xff] %v2256_v54  ;;  %v1086_v35 = vpop.f32.mrb[4].mxu1  ;;  %v1792_v9 = vmul.f32 %v2256_v54, %v2256_v54  ;;  %v1759_v53 = vadd.f32 %v2256_v54, %v2255_v52 }
 0x18e   : > { %v2257_v14 = vadd.f32 %v1695_v59, %v1086_v35  ;;  %v1088_v19 = vpop.f32.mrb[5].mxu1  ;;  %v1703_v49 = vpop.f32.mrb[6].mxu0 }
 0x18f   : > { %v2258_v24 = vadd.f32 %v1697_v30, %v1088_v19  ;;  %1806 = vadd.xlane.f32.xlu0 %v1805_v15  ;;  %v1808_v28 = vadd.f32 %v1792_v9, %v1791_v13  ;;  %v1705_v26 = vpop.f32.mrb[7].mxu0 }
 0x190   : > { %1744 = vst [vmem:[%s3114_s28 + $0x20] sm:$0xff] %v2257_v14  ;;  %v1793_v34 = vmul.f32 %v2257_v14, %v2257_v14 }
 0x191   : > { %1745 = vst [vmem:[%s3114_s28 + $0x28] sm:$0xff] %v2258_v24  ;;  %1809 = vadd.xlane.f32.xlu1 %v1808_v28  ;;  %v1096_v20 = vpop.f32.mrb[6].mxu1  ;;  %v1762_v43 = vadd.f32 %v2258_v24, %v2257_v14  ;;  %v1794_v42 = vmul.f32 %v2258_v24, %v2258_v24 }
 0x192   : > { %v2259_v55 = vadd.f32 %v1703_v49, %v1096_v20  ;;  %v1098_v56 = vpop.f32.mrb[7].mxu1  ;;  %v1711_v62 = vpop.f32.mrb[8].mxu0 }
 0x193   : > { %v2260_v63 = vadd.f32 %v1705_v26, %v1098_v56  ;;  %1760 = vadd.xlane.f32.xlu0 %v1759_v53  ;;  %v1713_v17 = vpop.f32.mrb[9].mxu0  ;;  %v1811_v22 = vadd.f32 %v1794_v42, %v1793_v34  ;;  %v1871_v56 = vld [vmem:[%s3114_s28 + $0x8] sm:$0xff] (%p2439_p5) }
 0x194   : > { %1746 = vst [vmem:[%s3114_s28 + $0x30] sm:$0xff] %v2259_v55  ;;  %v1795_v23 = vmul.f32 %v2259_v55, %v2259_v55  ;;  %1872 = vst [vmem:[%s1856_s13 + $0x8] sm:$0xff] (%p2439_p5), %v1871_v56 }
 0x195   : > { %1747 = vst [vmem:[%s3114_s28 + $0x38] sm:$0xff] %v2260_v63  ;;  %1763 = vadd.xlane.f32.xlu1 %v1762_v43  ;;  %v1106_v29 = vpop.f32.mrb[8].mxu1  ;;  %v1765_v31 = vadd.f32 %v2260_v63, %v2259_v55  ;;  %v1796_v32 = vmul.f32 %v2260_v63, %v2260_v63  ;;  %v1869_v55 = vld [vmem:[%s3114_s28] sm:$0xff] (%p2439_p5)  ;;  %v1875_v63 = vld [vmem:[%s3114_s28 + $0x18] sm:$0xff] (%p2439_p5) }
 0x196   : > { %v2261_v38 = vadd.f32 %v1711_v62, %v1106_v29  ;;  %v1108_v6 = vpop.f32.mrb[9].mxu1  ;;  %v1719_v61 = vpop.f32.mrb[10].mxu0  ;;  %v1873_v62 = vld [vmem:[%s3114_s28 + $0x10] sm:$0xff] (%p2439_p5)  ;;  %1870 = vst [vmem:[%s1856_s13] sm:$0xff] (%p2439_p5), %v1869_v55  ;;  %1876 = vst [vmem:[%s1856_s13 + $0x28] sm:$0xff] (%p2439_p5), %v1875_v63 }
 0x197   : > { %v2262_v7 = vadd.f32 %v1713_v17, %v1108_v6  ;;  %1812 = vadd.xlane.f32.xlu0 %v1811_v22  ;;  %v1721_v46 = vpop.f32.mrb[11].mxu0  ;;  %v1814_v4 = vadd.f32 %v1796_v32, %v1795_v23  ;;  %v1877_v17 = vld [vmem:[%s3114_s28 + $0x20] sm:$0xff] (%p2439_p5)  ;;  %1874 = vst [vmem:[%s1856_s13 + $0x20] sm:$0xff] (%p2439_p5), %v1873_v62 }
 0x198   : > { %1748 = vst [vmem:[%s3114_s28 + $0x40] sm:$0xff] %v2261_v38  ;;  %v1797_v37 = vmul.f32 %v2261_v38, %v2261_v38  ;;  %v1879_v22 = vld [vmem:[%s3114_s28 + $0x28] sm:$0xff] (%p2439_p5)  ;;  %1878 = vst [vmem:[%s1856_s13 + $0x40] sm:$0xff] (%p2439_p5), %v1877_v17 }
 0x199   : > { %1749 = vst [vmem:[%s3114_s28 + $0x48] sm:$0xff] %v2262_v7  ;;  %1766 = vadd.xlane.f32.xlu1 %v1765_v31  ;;  %v1116_v25 = vpop.f32.mrb[10].mxu1  ;;  %v1768_v40 = vadd.f32 %v2262_v7, %v2261_v38  ;;  %v1798_v27 = vmul.f32 %v2262_v7, %v2262_v7  ;;  %1880 = vst [vmem:[%s1856_s13 + $0x48] sm:$0xff] (%p2439_p5), %v1879_v22 }
 0x19a   : > { %v2263_v16 = vadd.f32 %v1719_v61, %v1116_v25  ;;  %v1118_v45 = vpop.f32.mrb[11].mxu1  ;;  %v1727_v44 = vpop.f32.mrb[12].mxu0 }
 0x19b   : > { %v2264_v36 = vadd.f32 %v1721_v46, %v1118_v45  ;;  %1769 = vadd.xlane.f32.xlu0 %v1768_v40  ;;  %v1729_v5 = vpop.f32.mrb[13].mxu0  ;;  %v1817_v50 = vadd.f32 %v1798_v27, %v1797_v37  ;;  %v1881_v23 = vld [vmem:[%s3114_s28 + $0x30] sm:$0xff] (%p2439_p5) }
 0x19c   : > { %1750 = vst [vmem:[%s3114_s28 + $0x50] sm:$0xff] %v2263_v16  ;;  %v1799_v58 = vmul.f32 %v2263_v16, %v2263_v16  ;;  %v1883_v29 = vld [vmem:[%s3114_s28 + $0x38] sm:$0xff] (%p2439_p5)  ;;  %1882 = vst [vmem:[%s1856_s13 + $0x60] sm:$0xff] (%p2439_p5), %v1881_v23 }
 0x19d   : > { %1751 = vst [vmem:[%s3114_s28 + $0x58] sm:$0xff] %v2264_v36  ;;  %1815 = vadd.xlane.f32.xlu1 %v1814_v4  ;;  %v1126_v3 = vpop.f32.mrb[12].mxu1  ;;  %v1771_v60 = vadd.f32 %v2264_v36, %v2263_v16  ;;  %v1800_v47 = vmul.f32 %v2264_v36, %v2264_v36  ;;  %1884 = vst [vmem:[%s1856_s13 + $0x68] sm:$0xff] (%p2439_p5), %v1883_v29 }
 0x19e   : > { %v2265_v48 = vadd.f32 %v1727_v44, %v1126_v3  ;;  %v1128_v39 = vpop.f32.mrb[13].mxu1  ;;  %v1735_v11 = vpop.f32.mrb[14].mxu0 }
 0x19f   : > { %v2266_v33 = vadd.f32 %v1729_v5, %v1128_v39  ;;  %1818 = vadd.xlane.f32.xlu0 %v1817_v50  ;;  %v1737_v8 = vpop.f32.mrb[15].mxu0  ;;  %v1820_v2 = vadd.f32 %v1800_v47, %v1799_v58  ;;  %v1885_v31 = vld [vmem:[%s3114_s28 + $0x40] sm:$0xff] (%p2439_p5) }
 0x1a0   : > { %1752 = vst [vmem:[%s3114_s28 + $0x60] sm:$0xff] %v2265_v48  ;;  %v1801_v57 = vmul.f32 %v2265_v48, %v2265_v48  ;;  %1886 = vst [vmem:[%s1856_s13 + $0x80] sm:$0xff] (%p2439_p5), %v1885_v31  ;;  %v1887_v32 = vld [vmem:[%s3114_s28 + $0x48] sm:$0xff] (%p2439_p5) }
 0x1a1   : > { %1753 = vst [vmem:[%s3114_s28 + $0x68] sm:$0xff] %v2266_v33  ;;  %1772 = vadd.xlane.f32.xlu1 %v1771_v60  ;;  %v1136_v41 = vpop.f32.mrb[14].mxu1  ;;  %v1774_v18 = vadd.f32 %v2266_v33, %v2265_v48  ;;  %v1802_v0 = vmul.f32 %v2266_v33, %v2266_v33  ;;  %1888 = vst [vmem:[%s1856_s13 + $0x88] sm:$0xff] (%p2439_p5), %v1887_v32 }
 0x1a2   : > { %v2267_v51 = vadd.f32 %v1735_v11, %v1136_v41  ;;  %v1138_v21 = vpop.f32.mrb[15].mxu1 }
 0x1a3   : > { %v2268_v12 = vadd.f32 %v1737_v8, %v1138_v21  ;;  %1775 = vadd.xlane.f32.xlu0 %v1774_v18  ;;  %v1823_v1 = vadd.f32 %v1802_v0, %v1801_v57  ;;  %v1889_v38 = vld [vmem:[%s3114_s28 + $0x50] sm:$0xff] (%p2439_p5) }
 0x1a4   : > { %1754 = vst [vmem:[%s3114_s28 + $0x70] sm:$0xff] %v2267_v51  ;;  %v1803_v52 = vmul.f32 %v2267_v51, %v2267_v51  ;;  %v1891_v6 = vld [vmem:[%s3114_s28 + $0x58] sm:$0xff] (%p2439_p5)  ;;  %1890 = vst [vmem:[%s1856_s13 + $0xa0] sm:$0xff] (%p2439_p5), %v1889_v38 }
 0x1a5   : > { %1755 = vst [vmem:[%s3114_s28 + $0x78] sm:$0xff] %v2268_v12  ;;  %1821 = vadd.xlane.f32.xlu1 %v1820_v2  ;;  %v1777_v10 = vadd.f32 %v2268_v12, %v2267_v51  ;;  %v1804_v59 = vmul.f32 %v2268_v12, %v2268_v12  ;;  %1892 = vst [vmem:[%s1856_s13 + $0xa8] sm:$0xff] (%p2439_p5), %v1891_v6 }
 0x1a7   : > { %1824 = vadd.xlane.f32.xlu0 %v1823_v1  ;;  %v1826_v54 = vadd.f32 %v1804_v59, %v1803_v52  ;;  %v1893_v61 = vld [vmem:[%s3114_s28 + $0x60] sm:$0xff] (%p2439_p5) }
 0x1a8   : > { %v1895_v7 = vld [vmem:[%s3114_s28 + $0x68] sm:$0xff] (%p2439_p5)  ;;  %1894 = vst [vmem:[%s1856_s13 + $0xc0] sm:$0xff] (%p2439_p5), %v1893_v61 }
 0x1a9   : > { %1778 = vadd.xlane.f32.xlu1 %v1777_v10  ;;  %1896 = vst [vmem:[%s1856_s13 + $0xc8] sm:$0xff] (%p2439_p5), %v1895_v7 }
 0x1ab   : > { %v1897_v46 = vld [vmem:[%s3114_s28 + $0x70] sm:$0xff] (%p2439_p5) }
 0x1ac   : > { %1898 = vst [vmem:[%s1856_s13 + $0xe0] sm:$0xff] (%p2439_p5), %v1897_v46  ;;  %v1899_v4 = vld [vmem:[%s3114_s28 + $0x78] sm:$0xff] (%p2439_p5) }
 0x1ad   : > { %1827 = vadd.xlane.f32.xlu1 %v1826_v54  ;;  %1900 = vst [vmem:[%s1856_s13 + $0xe8] sm:$0xff] (%p2439_p5), %v1899_v4 }
 0x218   : > { %v1758_v30 = vpop.xlane.xlu0 %1757 }
 0x219   : > { %1781 = vst.msk [vmem:[%s3137_s6] sm:$0xff] %vm1780_vm1, %v1758_v30 }
 0x21c   : > { %v1807_v15 = vpop.xlane.xlu0 %1806 }
 0x21d   : > { %1829 = vst.msk [vmem:[%s308_s9] sm:$0xff] %vm1780_vm1, %v1807_v15 }
 0x21e   : > { %v1810_v13 = vpop.xlane.xlu1 %1809 }
 0x21f   : > { %1830 = vst.msk [vmem:[%s308_s9 + $0x8] sm:$0xff] %vm1780_vm1, %v1810_v13 }
 0x220   : > { %v1761_v35 = vpop.xlane.xlu0 %1760 }
 0x221   : > { %1782 = vst.msk [vmem:[%s3137_s6 + $0x8] sm:$0xff] %vm1780_vm1, %v1761_v35 }
 0x222   : > { %v1764_v9 = vpop.xlane.xlu1 %1763 }
 0x223   : > { %1783 = vst.msk [vmem:[%s3137_s6 + $0x10] sm:$0xff] %vm1780_vm1, %v1764_v9 }
 0x224   : > { %v1813_v53 = vpop.xlane.xlu0 %1812 }
 0x225   : > { %1831 = vst.msk [vmem:[%s308_s9 + $0x10] sm:$0xff] %vm1780_vm1, %v1813_v53 }
 0x226   : > { %v1767_v14 = vpop.xlane.xlu1 %1766 }
 0x227   : > { %1784 = vst.msk [vmem:[%s3137_s6 + $0x18] sm:$0xff] %vm1780_vm1, %v1767_v14 }
 0x228   : > { %v1770_v19 = vpop.xlane.xlu0 %1769 }
 0x229   : > { %1785 = vst.msk [vmem:[%s3137_s6 + $0x20] sm:$0xff] %vm1780_vm1, %v1770_v19 }
 0x22a   : > { %v1816_v49 = vpop.xlane.xlu1 %1815 }
 0x22b   : > { %1832 = vst.msk [vmem:[%s308_s9 + $0x18] sm:$0xff] %vm1780_vm1, %v1816_v49 }
 0x22c   : > { %v1819_v24 = vpop.xlane.xlu0 %1818 }
 0x22d   : > { %1833 = vst.msk [vmem:[%s308_s9 + $0x20] sm:$0xff] %vm1780_vm1, %v1819_v24 }
 0x22e   : > { %v1773_v28 = vpop.xlane.xlu1 %1772 }
 0x22f   : > { %1786 = vst.msk [vmem:[%s3137_s6 + $0x28] sm:$0xff] %vm1780_vm1, %v1773_v28 }
 0x230   : > { %v1776_v26 = vpop.xlane.xlu0 %1775 }
 0x231   : > { %1787 = vst.msk [vmem:[%s3137_s6 + $0x30] sm:$0xff] %vm1780_vm1, %v1776_v26 }
 0x232   : > { %v1822_v34 = vpop.xlane.xlu1 %1821 }
 0x233   : > { %1834 = vst.msk [vmem:[%s308_s9 + $0x28] sm:$0xff] %vm1780_vm1, %v1822_v34 }
 0x234   : > { %v1825_v20 = vpop.xlane.xlu0 %1824 }
 0x235   : > { %1835 = vst.msk [vmem:[%s308_s9 + $0x30] sm:$0xff] %vm1780_vm1, %v1825_v20  ;;  %1853 = sbr.rel (!%p2439_p5) target bundleno = 572 (0x23c), region = 55 }
 0x236   : > { %v1779_v43 = vpop.xlane.xlu1 %1778 }
 0x237   : > { %1788 = vst.msk [vmem:[%s3137_s6 + $0x38] sm:$0xff] %vm1780_vm1, %v1779_v43 }
 0x23a   : > { %v1828_v42 = vpop.xlane.xlu1 %1827 }
 0x23b   : > { %1836 = vst.msk [vmem:[%s308_s9 + $0x38] sm:$0xff] %vm1780_vm1, %v1828_v42 }
 0x23c PF: > { %p12_p11 = scmp.ge.s32.totalorder %s2427_s19, 4   ;;  %s3346_s15 = smov %s2377_s16 }
 0x23d   : > { %s3347_s16 = smov %s2437_s22  ;;  %s3348_s17 = smov %s2427_s19 }
 0x23e   :  { %14 = sbr.rel (!%p12_p11) target bundleno = 2 (0x2), region = 133 }

</bundles_post_ra>
